<compile_context>
chip_gen: v7x
topology: tpu7x:2x2x1
jax: 0.10.0
libtpu: 0.0.40
codegen_flags: <defaults>
</compile_context>

<pallas_src>
import functools

import jax
import jax.numpy as jnp
from jax.experimental import pallas as pl
from jax.experimental.pallas import tpu as pltpu


# ------------------------------------------------------------------- kernel

def _tsrn_cell_kernel(inp_ref, hxk_ref, fcw_ref, fcb_ref, sx_ref, sy_ref,
                      wx_ref, wy_ref, cbx_ref, cby_ref, W_ref, b_ref, R_ref,
                      aws_ref, awcx_ref, awcy_ref, attb_ref,
                      out_ref, hxo_ref, *, B, N, D, K, V, M):
    """One TSRNCell step.  Activation rows are batch-major (row = b*N + n)."""
    BN = B * N
    half = D // 2
    bf16 = jnp.bfloat16
    f32 = jnp.float32

    # ---- activations, f32 ------------------------------------------------
    inp = inp_ref[...]                                   # (BN, D)
    h3 = [hxk_ref[k] for k in range(K)]                  # K x (B, N, D) views
    h2 = [h.reshape(BN, D) for h in h3]                  # free leading collapse

    inp_bf = inp.astype(bf16)
    h_bf = [h2[K - 1 - v].astype(bf16) for v in range(V)]

    # ---- fc gates: block-matmul accumulation, no concats ------------------
    # gate_o = sigmoid(inp @ Wfc[0,o] + sum_v h_{K-1-v} @ Wfc[1+v,o] + b_o)
    gates = []
    for o in range(V + 1):
        acc = jnp.dot(inp_bf, fcw_ref[0, o], preferred_element_type=f32)
        for v in range(V):
            acc = acc + jnp.dot(h_bf[v], fcw_ref[1 + v, o],
                                preferred_element_type=f32)
        gates.append(jax.nn.sigmoid(acc + fcb_ref[o]))    # (BN, D) f32
    u = gates[V]                                          # update gate
    g = [gates[v] * h2[K - 1 - v] for v in range(V)]      # gated prev states

    # x / y half-feature pieces (the D/2 split is inherent to the model)
    px = [inp[:, :half]] + [gv[:, :half] for gv in g]     # (1+V) x (BN, half)
    py = [inp[:, half:]] + [gv[:, half:] for gv in g]

    # ---- Chebyshev diffusion + projection, piece-wise accumulation --------
    # Supports stay f32 (precision); batched over B in one dot_general.
    sxb = jnp.broadcast_to(sx_ref[...], (B, N, N))        # hoisted broadcast
    syb = jnp.broadcast_to(sy_ref[...], (B, N, N))

    def diffuse_project(pieces, s_b, w_ref):
        # returns sum_{p,m} T_m(S) piece_p @ W[p, m]  as (BN, half) f32
        acc = None
        for p, piece in enumerate(pieces):
            x0 = piece.reshape(B, N, half)                # free leading split
            xm, xprev = x0, None
            for m in range(M):
                if m == 1:
                    xprev = x0
                    xm = jnp.einsum('buv,bvf->buf', s_b, x0,
                                    preferred_element_type=f32)
                elif m >= 2:
                    xnew = 2.0 * jnp.einsum('buv,bvf->buf', s_b, xm,
                                            preferred_element_type=f32) - xprev
                    xprev, xm = xm, xnew
                term = jnp.dot(xm.reshape(BN, half).astype(bf16), w_ref[p, m],
                               preferred_element_type=f32)
                acc = term if acc is None else acc + term
        return acc

    convx = diffuse_project(px, sxb, wx_ref).reshape(B, N, half) + cbx_ref[...]
    convy = diffuse_project(py, syb, wy_ref).reshape(B, N, half) + cby_ref[...]
    convx = jnp.where(convx >= 0.0, convx, 0.01 * convx)  # leaky_relu(0.01)
    convy = jnp.where(convy >= 0.0, convy, 0.01 * convy)

    # ---- output projection: W row-block accumulation (no conv concat) -----
    Wv = W_ref[...]                                       # (D, D) bf16
    out_lin = (jnp.dot(convx.reshape(BN, half).astype(bf16), Wv[:half, :],
                       preferred_element_type=f32)
               + jnp.dot(convy.reshape(BN, half).astype(bf16), Wv[half:, :],
                         preferred_element_type=f32))
    out0 = jnp.tanh(out_lin.reshape(B, N, D) + b_ref[...])  # (B, N, D)

    # ---- attention "reasoning": VPU multiply + lane reduce (no (D,1) MXU) --
    aws = aws_ref[...]                                     # (1, 1, D)
    states = [h3[k] + R_ref[k] for k in range(K)]          # (B, N, D)
    sc_cur = (jnp.sum(convx * awcx_ref[...], axis=-1, keepdims=True)
              + jnp.sum(convy * awcy_ref[...], axis=-1, keepdims=True)
              + attb_ref[0])                               # (B, N, 1)
    scores = [jnp.sum(states[k] * aws, axis=-1, keepdims=True) + sc_cur
              for k in range(K)]

    # softmax over the K previous states (K small & static), exact divide so
    # the attention weights sum to 1.
    m_s = scores[0]
    for k in range(1, K):
        m_s = jnp.maximum(m_s, scores[k])
    es = [jnp.exp(s - m_s) for s in scores]
    den = es[0]
    for k in range(1, K):
        den = den + es[k]
    inv = 1.0 / den
    reas = (es[0] * inv) * states[0]
    for k in range(1, K):
        reas = reas + (es[k] * inv) * states[k]

    u3 = u.reshape(B, N, D)
    out3 = (1.0 - u3) * out0 + u3 * reas                   # (B, N, D)

    out_ref[...] = out3
    # roll hx in place (hxo aliases the hx HBM buffer via input_output_aliases)
    for k in range(K - 1):
        hxo_ref[k] = h3[k + 1]
    hxo_ref[K - 1] = out3


# ------------------------------------------------- step-invariant preprocessing

def prepare_tsrn_params(p, *, num_units, num_nodes, pre_k, pre_v,
                        max_diffusion_step):
    """Builds kernel-ready params.  Call ONCE outside the RNN timestep loop."""
    D, N, K, V = num_units, num_nodes, pre_k, pre_v
    half = D // 2
    M = max_diffusion_step + 1
    f32, bf16 = jnp.float32, jnp.bfloat16

    def cheb(S, x):
        outs = [x]
        if M > 1:
            x0, x1 = x, S @ x
            outs.append(x1)
            for _ in range(2, M):
                x2 = 2.0 * (S @ x1) - x0
                outs.append(x2)
                x0, x1 = x1, x2
        return outs

    # fold the (step-invariant) gonv_random diffusion+projection into a
    # per-node conv bias -> it never has to be tiled / diffused per step.
    gr = p['gonv_random'].astype(f32)
    Sx = p['support'].astype(f32)
    Sy = p['support0'].astype(f32)
    grx, gry = cheb(Sx, gr), cheb(Sy, gr)
    cbx = sum(grx[m] @ p['gconv_wx_gr'][m].astype(f32) for m in range(M))
    cby = sum(gry[m] @ p['gconv_wy_gr'][m].astype(f32) for m in range(M))
    cbx = cbx + p['gconv_b'][:half].astype(f32)[None, :]
    cby = cby + p['gconv_b'][half:].astype(f32)[None, :]

    aw = p['att_w'].astype(f32).reshape(-1)                # (2D,)
    return {
        'fc_w': p['fc_w'].astype(bf16),                    # (1+V, 1+V, D, D)
        'fc_b': p['fc_b'].astype(f32).reshape(V + 1, 1, D),
        'support': Sx,                                     # (N, N) f32
        'support0': Sy,
        'gconv_wx': p['gconv_wx'].astype(bf16),            # (1+V, M, D/2, D/2)
        'gconv_wy': p['gconv_wy'].astype(bf16),
        'conv_bias_x': cbx.reshape(1, N, half),
        'conv_bias_y': cby.reshape(1, N, half),
        'W': p['W'].astype(bf16),                          # (D, D)
        'b': p['b'].astype(f32).reshape(1, N, D),
        'R': p['R'].astype(f32).reshape(K, 1, N, D),
        'att_w_state': aw[:D].reshape(1, 1, D),
        'att_w_cur_x': aw[D:D + half].reshape(1, 1, half),
        'att_w_cur_y': aw[D + half:].reshape(1, 1, half),
        'att_b': p['att_b'].astype(f32).reshape(1),
    }


# ------------------------------------------------------------------ wrapper

def tsrn_cell_forward(kp, inputs, hx_kfirst, *, num_units, num_nodes, pre_k,
                      pre_v, max_diffusion_step):
    """One TSRNCell step.

    inputs:    (B, num_nodes * input_dim) with input_dim == num_units
    hx_kfirst: (pre_k, B, num_nodes, num_units)  -- kernel-native layout;
               keep this layout across RNN steps (transpose once per sequence).
    returns (output (B, num_nodes*num_units), hx_new (pre_k, B, N, D)).
    """
    K, B, N, D = hx_kfirst.shape
    assert K == pre_k and N == num_nodes and D == num_units
    assert 1 <= pre_v <= pre_k and D % 2 == 0
    assert inputs.shape == (B, N * D)      # input_dim must equal num_units
    V = pre_v
    M = max_diffusion_step + 1

    inp2d = inputs.reshape(B * N, D).astype(jnp.float32)   # free bitcast

    kern = functools.partial(_tsrn_cell_kernel, B=B, N=N, D=D, K=K, V=V, M=M)
    vspec = pl.BlockSpec(memory_space=pltpu.MemorySpace.VMEM)
    sspec = pl.BlockSpec(memory_space=pltpu.MemorySpace.SMEM)

    out3, hx_new = pl.pallas_call(
        kern,
        out_shape=(jax.ShapeDtypeStruct((B, N, D), jnp.float32),
                   jax.ShapeDtypeStruct((K, B, N, D), jnp.float32)),
        in_specs=[vspec] * 16 + [sspec],
        out_specs=(vspec, vspec),
        input_output_aliases={1: 1},     # hx buffer rolled in place
        compiler_params=pltpu.CompilerParams(
            vmem_limit_bytes=32 * 1024 * 1024),
    )(inp2d, hx_kfirst, kp['fc_w'], kp['fc_b'], kp['support'], kp['support0'],
      kp['gconv_wx'], kp['gconv_wy'], kp['conv_bias_x'], kp['conv_bias_y'],
      kp['W'], kp['b'], kp['R'],
      kp['att_w_state'], kp['att_w_cur_x'], kp['att_w_cur_y'], kp['att_b'])

    # (B, N, D) -> (B, N*D) is a metadata-only reshape at the XLA level.
    return out3.reshape(B, N * D), hx_new


# --------------------------------------------------------------- pure-JAX ref
# Torch-faithful f32 reference (concatenated features, flat weights, torch
# (feature, order)-major gconv weight rows) used only for verification.

def tsrn_cell_reference(p, inputs, hx_k, *, num_units, num_nodes, pre_k,
                        pre_v, max_diffusion_step):
    f32 = jnp.float32
    bs, K, n, d = hx_k.shape
    V, half = pre_v, d // 2
    M = max_diffusion_step + 1
    rand = p['gonv_random'].shape[-1]

    fc_flat = jnp.transpose(p['fc_w'], (0, 2, 1, 3)).reshape(
        (V + 1) * d, (V + 1) * d)

    def flat_gw(wblk, wgr):
        a = jnp.transpose(wblk, (0, 2, 1, 3)).reshape((V + 1) * half * M, half)
        g = jnp.transpose(wgr, (1, 0, 2)).reshape(rand * M, half)
        return jnp.concatenate([a, g], axis=0)             # rows = (f, m)

    wx_flat = flat_gw(p['gconv_wx'], p['gconv_wx_gr'])
    wy_flat = flat_gw(p['gconv_wy'], p['gconv_wy_gr'])

    inp = inputs.reshape(bs, n, d).astype(f32)
    preH = jnp.concatenate([hx_k[:, K - 1 - v] for v in range(V)], axis=-1)
    x_fc = jnp.concatenate([inp, preH], axis=-1).reshape(bs * n, -1)
    value = jax.nn.sigmoid(x_fc @ fc_flat + p['fc_b'][None])
    value = value.reshape(bs, n, -1)
    r, u = value[..., :d * V], value[..., d * V:]
    state = (r * preH).reshape(bs, n, V, d)
    statex = state[..., :half].reshape(bs, n, -1)
    statey = state[..., half:].reshape(bs, n, -1)
    gr = jnp.broadcast_to(p['gonv_random'][None], (bs, n, rand))
    xf = jnp.concatenate([inp[..., :half], statex, gr], axis=-1)
    yf = jnp.concatenate([inp[..., half:], statey, gr], axis=-1)

    def cheb(x, S):
        outs = [x]
        if max_diffusion_step >= 1:
            x0 = x
            x1 = jnp.einsum('uv,bvf->buf', S, x0)
            outs.append(x1)
            for _ in range(2, max_diffusion_step + 1):
                x2 = 2.0 * jnp.einsum('uv,bvf->buf', S, x1) - x0
                outs.append(x2)
                x1, x0 = x2, x1
        return jnp.stack(outs, axis=-1)                     # (bs, n, F, M)

    xs = cheb(xf, p['support']).reshape(bs * n, -1)
    ys = cheb(yf, p['support0']).reshape(bs * n, -1)
    conv = jnp.concatenate([xs @ wx_flat, ys @ wy_flat], axis=-1)
    conv = conv + p['gconv_b'][None]
    conv = jnp.where(conv >= 0.0, conv, 0.01 * conv).reshape(bs, n, d)

    out0 = jnp.tanh(conv @ p['W'] + p['b'][None])
    states = hx_k + p['R'][None]
    aw = p['att_w'].astype(f32)
    sc = (jnp.einsum('bknd,de->bkne', states, aw[:d])
          + jnp.einsum('bnd,de->bne', conv, aw[d:])[:, None]
          + p['att_b'][0])
    w = jax.nn.softmax(sc, axis=1)
    reas = (states * w).sum(axis=1)
    out = (1.0 - u) * out0 + u * reas
    hx_new = jnp.concatenate([hx_k[:, 1:], out[:, None]], axis=1)
    return out.reshape(bs, n * d), hx_new


# ---------------------------------------------------------------- init utils

def _xavier_normal(key, shape, fan_in, fan_out):
    std = (2.0 / (fan_in + fan_out)) ** 0.5
    w = std * jax.random.normal(key, shape, dtype=jnp.float32)
    # keep weights exactly bf16-representable so the bf16 MXU path and the f32
    # reference see the same weight values.
    return w.astype(jnp.bfloat16).astype(jnp.float32)


def _random_walk_support(adj):
    # utils.calculate_random_walk_matrix(adj).T == (D^-1 A)^T, dense stand-in.
    deg = adj.sum(axis=1)
    d_inv = jnp.where(deg > 0, 1.0 / deg, 0.0)
    return (d_inv[:, None] * adj).T


if __name__ == "__main__":
    B = 2
    num_nodes = 16
    num_units = 32            # rnn_units == input_dim (required by _gconv split)
    input_dim = num_units
    pre_k = 3
    pre_v = 2
    max_diffusion_step = 2
    rand_dim = 8              # width of gonv_random (layer == 0 path)

    M = max_diffusion_step + 1
    half = num_units // 2
    F_tot = half * (pre_v + 1) + rand_dim

    key = jax.random.PRNGKey(0)
    keys = jax.random.split(key, 20)

    adj = jnp.abs(jax.random.uniform(keys[0], (num_nodes, num_nodes))) \
        + jnp.eye(num_nodes)
    adj0 = jnp.abs(jax.random.uniform(keys[1], (num_nodes, num_nodes))) \
        + jnp.eye(num_nodes)

    # Weights are stored in matmul-block layout (a torch checkpoint would need
    # a one-time (feature, order) -> (block, order) row reordering).
    # Torch-zero-initialized W/b/R/attlinear get small random values so every
    # compute path is exercised.
    params = {
        'fc_w': _xavier_normal(keys[2],
                               (pre_v + 1, pre_v + 1, num_units, num_units),
                               (pre_v + 1) * num_units, (pre_v + 1) * num_units),
        'fc_b': jnp.zeros(((pre_v + 1) * num_units,), jnp.float32),
        'gconv_wx': _xavier_normal(keys[3], (pre_v + 1, M, half, half),
                                   F_tot * M, half),
        'gconv_wx_gr': _xavier_normal(keys[4], (M, rand_dim, half),
                                      F_tot * M, half),
        'gconv_wy': _xavier_normal(keys[5], (pre_v + 1, M, half, half),
                                   F_tot * M, half),
        'gconv_wy_gr': _xavier_normal(keys[6], (M, rand_dim, half),
                                      F_tot * M, half),
        'gconv_b': jnp.zeros((num_units,), jnp.float32),     # bias_start=0.0
        'W': (0.1 * jax.random.normal(keys[7], (num_units, num_units))
              ).astype(jnp.bfloat16).astype(jnp.float32),
        'b': 0.1 * jax.random.normal(keys[8], (num_nodes, num_units),
                                     jnp.float32),
        'R': 0.1 * jax.random.normal(keys[9], (pre_k, num_nodes, num_units),
                                     jnp.float32),
        'att_w': 0.1 * jax.random.normal(keys[10], (2 * num_units, 1),
                                         jnp.float32),
        'att_b': 0.1 * jax.random.normal(keys[11], (1,), jnp.float32),
        'gonv_random': jax.random.normal(keys[12], (num_nodes, rand_dim),
                                         jnp.float32),
        'support': _random_walk_support(adj),
        'support0': _random_walk_support(adj0),
    }

    inputs = jax.random.normal(keys[13], (B, num_nodes * input_dim),
                               jnp.float32)
    hx_k_torch = jax.random.normal(keys[14],
                                   (B, pre_k, num_nodes, num_units),
                                   jnp.float32)

    # Pure-JAX f32 reference, computed BEFORE the kernel step because the hx
    # buffer handed to the step below is donated / updated in place.
    ref_out, ref_hx = tsrn_cell_reference(
        params, inputs, hx_k_torch, num_units=num_units, num_nodes=num_nodes,
        pre_k=pre_k, pre_v=pre_v, max_diffusion_step=max_diffusion_step)

    # Step-invariant preprocessing (hoisted out of the per-step path).
    kparams = prepare_tsrn_params(
        params, num_units=num_units, num_nodes=num_nodes, pre_k=pre_k,
        pre_v=pre_v, max_diffusion_step=max_diffusion_step)

    # Kernel-native hx layout (pre_k, B, N, D); keep it across RNN steps.
    hx_kfirst = jnp.transpose(hx_k_torch, (1, 0, 2, 3))

    step = jax.jit(
        functools.partial(
            tsrn_cell_forward, num_units=num_units, num_nodes=num_nodes,
            pre_k=pre_k, pre_v=pre_v,
            max_diffusion_step=max_diffusion_step),
        donate_argnums=(2,))

    output, hx_new = step(kparams, inputs, hx_kfirst)
    jax.block_until_ready((output, hx_new))

    assert output.shape == (B, num_nodes * num_units)
    assert hx_new.shape == (pre_k, B, num_nodes, num_units)

    # Compare against the reference (kernel uses bf16 MXU operands for the
    # learned weights; everything else is f32, so errors stay ~1e-2).
    hx_new_torch = jnp.transpose(hx_new, (1, 0, 2, 3))
    assert jnp.allclose(output, ref_out, atol=5e-2, rtol=5e-2)
    assert jnp.allclose(hx_new_torch, ref_hx, atol=5e-2, rtol=5e-2)

    print("KERNEL_OK")
</pallas_src>

<mosaic_0001>
module attributes {stable_mosaic.version = 11 : i64} {
  func.func @_tsrn_cell_kernel(%arg0: memref<32x32xf32, #tpu.memory_space<vmem>>, %arg1: memref<3x2x16x32xf32, #tpu.memory_space<vmem>>, %arg2: memref<3x3x32x32xbf16, #tpu.memory_space<vmem>>, %arg3: memref<3x1x32xf32, #tpu.memory_space<vmem>>, %arg4: memref<16x16xf32, #tpu.memory_space<vmem>>, %arg5: memref<16x16xf32, #tpu.memory_space<vmem>>, %arg6: memref<3x3x16x16xbf16, #tpu.memory_space<vmem>>, %arg7: memref<3x3x16x16xbf16, #tpu.memory_space<vmem>>, %arg8: memref<1x16x16xf32, #tpu.memory_space<vmem>>, %arg9: memref<1x16x16xf32, #tpu.memory_space<vmem>>, %arg10: memref<32x32xbf16, #tpu.memory_space<vmem>>, %arg11: memref<1x16x32xf32, #tpu.memory_space<vmem>>, %arg12: memref<3x1x16x32xf32, #tpu.memory_space<vmem>>, %arg13: memref<1x1x32xf32, #tpu.memory_space<vmem>>, %arg14: memref<1x1x16xf32, #tpu.memory_space<vmem>>, %arg15: memref<1x1x16xf32, #tpu.memory_space<vmem>>, %arg16: memref<1xf32, #tpu.memory_space<smem>>, %arg17: memref<2x16x32xf32, #tpu.memory_space<vmem>>, %arg18: memref<3x2x16x32xf32, #tpu.memory_space<vmem>>) attributes {dimension_semantics = [], scalar_prefetch = 0 : i64, scratch_operands = 0 : i64, tpu.core_type = #tpu.core_type<tc>} {
    %c0 = arith.constant 0 : index
    %c0_0 = arith.constant 0 : index
    %0 = vector.load %arg0[%c0, %c0_0] : memref<32x32xf32, #tpu.memory_space<vmem>>, vector<32x32xf32>
    %c0_1 = arith.constant 0 : index
    %c0_2 = arith.constant 0 : index
    %c0_3 = arith.constant 0 : index
    %c0_4 = arith.constant 0 : index
    %1 = vector.load %arg1[%c0_1, %c0_2, %c0_3, %c0_4] : memref<3x2x16x32xf32, #tpu.memory_space<vmem>>, vector<1x2x16x32xf32>
    %2 = vector.shape_cast %1 : vector<1x2x16x32xf32> to vector<2x16x32xf32>
    %c1 = arith.constant 1 : index
    %c0_5 = arith.constant 0 : index
    %c0_6 = arith.constant 0 : index
    %c0_7 = arith.constant 0 : index
    %3 = vector.load %arg1[%c1, %c0_5, %c0_6, %c0_7] : memref<3x2x16x32xf32, #tpu.memory_space<vmem>>, vector<1x2x16x32xf32>
    %4 = vector.shape_cast %3 : vector<1x2x16x32xf32> to vector<2x16x32xf32>
    %c2 = arith.constant 2 : index
    %c0_8 = arith.constant 0 : index
    %c0_9 = arith.constant 0 : index
    %c0_10 = arith.constant 0 : index
    %5 = vector.load %arg1[%c2, %c0_8, %c0_9, %c0_10] : memref<3x2x16x32xf32, #tpu.memory_space<vmem>>, vector<1x2x16x32xf32>
    %6 = vector.shape_cast %5 : vector<1x2x16x32xf32> to vector<2x16x32xf32>
    %7 = vector.shape_cast %4 : vector<2x16x32xf32> to vector<32x32xf32>
    %8 = vector.shape_cast %6 : vector<2x16x32xf32> to vector<32x32xf32>
    %9 = arith.truncf %0 : vector<32x32xf32> to vector<32x32xbf16>
    %10 = arith.truncf %8 : vector<32x32xf32> to vector<32x32xbf16>
    %11 = arith.truncf %7 : vector<32x32xf32> to vector<32x32xbf16>
    %c0_11 = arith.constant 0 : index
    %c0_12 = arith.constant 0 : index
    %c0_13 = arith.constant 0 : index
    %c0_14 = arith.constant 0 : index
    %12 = vector.load %arg2[%c0_11, %c0_12, %c0_13, %c0_14] : memref<3x3x32x32xbf16, #tpu.memory_space<vmem>>, vector<1x1x32x32xbf16>
    %13 = vector.shape_cast %12 : vector<1x1x32x32xbf16> to vector<32x32xbf16>
    %cst = arith.constant dense<0.000000e+00> : vector<32x32xf32>
    %14 = tpu.matmul %9, %13, %cst {dimension_numbers = #tpu.dot_dimension_numbers<[1], [0], [0], [1], [0, 0, 1, 1], [], []>} : vector<32x32xbf16>, vector<32x32xbf16>, vector<32x32xf32> -> vector<32x32xf32>
    %c1_15 = arith.constant 1 : index
    %c0_16 = arith.constant 0 : index
    %c0_17 = arith.constant 0 : index
    %c0_18 = arith.constant 0 : index
    %15 = vector.load %arg2[%c1_15, %c0_16, %c0_17, %c0_18] : memref<3x3x32x32xbf16, #tpu.memory_space<vmem>>, vector<1x1x32x32xbf16>
    %16 = vector.shape_cast %15 : vector<1x1x32x32xbf16> to vector<32x32xbf16>
    %cst_19 = arith.constant dense<0.000000e+00> : vector<32x32xf32>
    %17 = tpu.matmul %10, %16, %cst_19 {dimension_numbers = #tpu.dot_dimension_numbers<[1], [0], [0], [1], [0, 0, 1, 1], [], []>} : vector<32x32xbf16>, vector<32x32xbf16>, vector<32x32xf32> -> vector<32x32xf32>
    %18 = arith.addf %14, %17 : vector<32x32xf32>
    %c2_20 = arith.constant 2 : index
    %c0_21 = arith.constant 0 : index
    %c0_22 = arith.constant 0 : index
    %c0_23 = arith.constant 0 : index
    %19 = vector.load %arg2[%c2_20, %c0_21, %c0_22, %c0_23] : memref<3x3x32x32xbf16, #tpu.memory_space<vmem>>, vector<1x1x32x32xbf16>
    %20 = vector.shape_cast %19 : vector<1x1x32x32xbf16> to vector<32x32xbf16>
    %cst_24 = arith.constant dense<0.000000e+00> : vector<32x32xf32>
    %21 = tpu.matmul %11, %20, %cst_24 {dimension_numbers = #tpu.dot_dimension_numbers<[1], [0], [0], [1], [0, 0, 1, 1], [], []>} : vector<32x32xbf16>, vector<32x32xbf16>, vector<32x32xf32> -> vector<32x32xf32>
    %22 = arith.addf %18, %21 : vector<32x32xf32>
    %c0_25 = arith.constant 0 : index
    %c0_26 = arith.constant 0 : index
    %c0_27 = arith.constant 0 : index
    %23 = vector.load %arg3[%c0_25, %c0_26, %c0_27] : memref<3x1x32xf32, #tpu.memory_space<vmem>>, vector<1x1x32xf32>
    %24 = vector.shape_cast %23 : vector<1x1x32xf32> to vector<1x32xf32>
    %25 = vector.broadcast %24 : vector<1x32xf32> to vector<32x32xf32>
    %26 = arith.addf %22, %25 : vector<32x32xf32>
    %27 = arith.negf %26 : vector<32x32xf32>
    %28 = math.exp %27 : vector<32x32xf32>
    %cst_28 = arith.constant 1.000000e+00 : f32
    %29 = vector.broadcast %cst_28 : f32 to vector<32x32xf32>
    %30 = arith.addf %29, %28 : vector<32x32xf32>
    %31 = arith.divf %29, %30 : vector<32x32xf32>
    %c0_29 = arith.constant 0 : index
    %c1_30 = arith.constant 1 : index
    %c0_31 = arith.constant 0 : index
    %c0_32 = arith.constant 0 : index
    %32 = vector.load %arg2[%c0_29, %c1_30, %c0_31, %c0_32] : memref<3x3x32x32xbf16, #tpu.memory_space<vmem>>, vector<1x1x32x32xbf16>
    %33 = vector.shape_cast %32 : vector<1x1x32x32xbf16> to vector<32x32xbf16>
    %cst_33 = arith.constant dense<0.000000e+00> : vector<32x32xf32>
    %34 = tpu.matmul %9, %33, %cst_33 {dimension_numbers = #tpu.dot_dimension_numbers<[1], [0], [0], [1], [0, 0, 1, 1], [], []>} : vector<32x32xbf16>, vector<32x32xbf16>, vector<32x32xf32> -> vector<32x32xf32>
    %c1_34 = arith.constant 1 : index
    %c1_35 = arith.constant 1 : index
    %c0_36 = arith.constant 0 : index
    %c0_37 = arith.constant 0 : index
    %35 = vector.load %arg2[%c1_34, %c1_35, %c0_36, %c0_37] : memref<3x3x32x32xbf16, #tpu.memory_space<vmem>>, vector<1x1x32x32xbf16>
    %36 = vector.shape_cast %35 : vector<1x1x32x32xbf16> to vector<32x32xbf16>
    %cst_38 = arith.constant dense<0.000000e+00> : vector<32x32xf32>
    %37 = tpu.matmul %10, %36, %cst_38 {dimension_numbers = #tpu.dot_dimension_numbers<[1], [0], [0], [1], [0, 0, 1, 1], [], []>} : vector<32x32xbf16>, vector<32x32xbf16>, vector<32x32xf32> -> vector<32x32xf32>
    %38 = arith.addf %34, %37 : vector<32x32xf32>
    %c2_39 = arith.constant 2 : index
    %c1_40 = arith.constant 1 : index
    %c0_41 = arith.constant 0 : index
    %c0_42 = arith.constant 0 : index
    %39 = vector.load %arg2[%c2_39, %c1_40, %c0_41, %c0_42] : memref<3x3x32x32xbf16, #tpu.memory_space<vmem>>, vector<1x1x32x32xbf16>
    %40 = vector.shape_cast %39 : vector<1x1x32x32xbf16> to vector<32x32xbf16>
    %cst_43 = arith.constant dense<0.000000e+00> : vector<32x32xf32>
    %41 = tpu.matmul %11, %40, %cst_43 {dimension_numbers = #tpu.dot_dimension_numbers<[1], [0], [0], [1], [0, 0, 1, 1], [], []>} : vector<32x32xbf16>, vector<32x32xbf16>, vector<32x32xf32> -> vector<32x32xf32>
    %42 = arith.addf %38, %41 : vector<32x32xf32>
    %c1_44 = arith.constant 1 : index
    %c0_45 = arith.constant 0 : index
    %c0_46 = arith.constant 0 : index
    %43 = vector.load %arg3[%c1_44, %c0_45, %c0_46] : memref<3x1x32xf32, #tpu.memory_space<vmem>>, vector<1x1x32xf32>
    %44 = vector.shape_cast %43 : vector<1x1x32xf32> to vector<1x32xf32>
    %45 = vector.broadcast %44 : vector<1x32xf32> to vector<32x32xf32>
    %46 = arith.addf %42, %45 : vector<32x32xf32>
    %47 = arith.negf %46 : vector<32x32xf32>
    %48 = math.exp %47 : vector<32x32xf32>
    %cst_47 = arith.constant 1.000000e+00 : f32
    %49 = vector.broadcast %cst_47 : f32 to vector<32x32xf32>
    %50 = arith.addf %49, %48 : vector<32x32xf32>
    %51 = arith.divf %49, %50 : vector<32x32xf32>
    %c0_48 = arith.constant 0 : index
    %c2_49 = arith.constant 2 : index
    %c0_50 = arith.constant 0 : index
    %c0_51 = arith.constant 0 : index
    %52 = vector.load %arg2[%c0_48, %c2_49, %c0_50, %c0_51] : memref<3x3x32x32xbf16, #tpu.memory_space<vmem>>, vector<1x1x32x32xbf16>
    %53 = vector.shape_cast %52 : vector<1x1x32x32xbf16> to vector<32x32xbf16>
    %cst_52 = arith.constant dense<0.000000e+00> : vector<32x32xf32>
    %54 = tpu.matmul %9, %53, %cst_52 {dimension_numbers = #tpu.dot_dimension_numbers<[1], [0], [0], [1], [0, 0, 1, 1], [], []>} : vector<32x32xbf16>, vector<32x32xbf16>, vector<32x32xf32> -> vector<32x32xf32>
    %c1_53 = arith.constant 1 : index
    %c2_54 = arith.constant 2 : index
    %c0_55 = arith.constant 0 : index
    %c0_56 = arith.constant 0 : index
    %55 = vector.load %arg2[%c1_53, %c2_54, %c0_55, %c0_56] : memref<3x3x32x32xbf16, #tpu.memory_space<vmem>>, vector<1x1x32x32xbf16>
    %56 = vector.shape_cast %55 : vector<1x1x32x32xbf16> to vector<32x32xbf16>
    %cst_57 = arith.constant dense<0.000000e+00> : vector<32x32xf32>
    %57 = tpu.matmul %10, %56, %cst_57 {dimension_numbers = #tpu.dot_dimension_numbers<[1], [0], [0], [1], [0, 0, 1, 1], [], []>} : vector<32x32xbf16>, vector<32x32xbf16>, vector<32x32xf32> -> vector<32x32xf32>
    %58 = arith.addf %54, %57 : vector<32x32xf32>
    %c2_58 = arith.constant 2 : index
    %c2_59 = arith.constant 2 : index
    %c0_60 = arith.constant 0 : index
    %c0_61 = arith.constant 0 : index
    %59 = vector.load %arg2[%c2_58, %c2_59, %c0_60, %c0_61] : memref<3x3x32x32xbf16, #tpu.memory_space<vmem>>, vector<1x1x32x32xbf16>
    %60 = vector.shape_cast %59 : vector<1x1x32x32xbf16> to vector<32x32xbf16>
    %cst_62 = arith.constant dense<0.000000e+00> : vector<32x32xf32>
    %61 = tpu.matmul %11, %60, %cst_62 {dimension_numbers = #tpu.dot_dimension_numbers<[1], [0], [0], [1], [0, 0, 1, 1], [], []>} : vector<32x32xbf16>, vector<32x32xbf16>, vector<32x32xf32> -> vector<32x32xf32>
    %62 = arith.addf %58, %61 : vector<32x32xf32>
    %c2_63 = arith.constant 2 : index
    %c0_64 = arith.constant 0 : index
    %c0_65 = arith.constant 0 : index
    %63 = vector.load %arg3[%c2_63, %c0_64, %c0_65] : memref<3x1x32xf32, #tpu.memory_space<vmem>>, vector<1x1x32xf32>
    %64 = vector.shape_cast %63 : vector<1x1x32xf32> to vector<1x32xf32>
    %65 = vector.broadcast %64 : vector<1x32xf32> to vector<32x32xf32>
    %66 = arith.addf %62, %65 : vector<32x32xf32>
    %67 = arith.negf %66 : vector<32x32xf32>
    %68 = math.exp %67 : vector<32x32xf32>
    %cst_66 = arith.constant 1.000000e+00 : f32
    %69 = vector.broadcast %cst_66 : f32 to vector<32x32xf32>
    %70 = arith.addf %69, %68 : vector<32x32xf32>
    %71 = arith.divf %69, %70 : vector<32x32xf32>
    %72 = arith.mulf %31, %8 : vector<32x32xf32>
    %73 = arith.mulf %51, %7 : vector<32x32xf32>
    %74 = vector.extract_strided_slice %0 {offsets = [0, 0], sizes = [32, 16], strides = [1, 1]} : vector<32x32xf32> to vector<32x16xf32>
    %75 = vector.extract_strided_slice %72 {offsets = [0, 0], sizes = [32, 16], strides = [1, 1]} : vector<32x32xf32> to vector<32x16xf32>
    %76 = vector.extract_strided_slice %73 {offsets = [0, 0], sizes = [32, 16], strides = [1, 1]} : vector<32x32xf32> to vector<32x16xf32>
    %77 = vector.extract_strided_slice %0 {offsets = [0, 16], sizes = [32, 16], strides = [1, 1]} : vector<32x32xf32> to vector<32x16xf32>
    %78 = vector.extract_strided_slice %72 {offsets = [0, 16], sizes = [32, 16], strides = [1, 1]} : vector<32x32xf32> to vector<32x16xf32>
    %79 = vector.extract_strided_slice %73 {offsets = [0, 16], sizes = [32, 16], strides = [1, 1]} : vector<32x32xf32> to vector<32x16xf32>
    %c0_67 = arith.constant 0 : index
    %c0_68 = arith.constant 0 : index
    %80 = vector.load %arg4[%c0_67, %c0_68] : memref<16x16xf32, #tpu.memory_space<vmem>>, vector<16x16xf32>
    %81 = vector.shape_cast %80 : vector<16x16xf32> to vector<1x16x16xf32>
    %82 = vector.broadcast %81 : vector<1x16x16xf32> to vector<2x16x16xf32>
    %c0_69 = arith.constant 0 : index
    %c0_70 = arith.constant 0 : index
    %83 = vector.load %arg5[%c0_69, %c0_70] : memref<16x16xf32, #tpu.memory_space<vmem>>, vector<16x16xf32>
    %84 = vector.shape_cast %83 : vector<16x16xf32> to vector<1x16x16xf32>
    %85 = vector.broadcast %84 : vector<1x16x16xf32> to vector<2x16x16xf32>
    %86 = vector.shape_cast %74 : vector<32x16xf32> to vector<2x16x16xf32>
    %87 = vector.shape_cast %86 : vector<2x16x16xf32> to vector<32x16xf32>
    %88 = arith.truncf %87 : vector<32x16xf32> to vector<32x16xbf16>
    %c0_71 = arith.constant 0 : index
    %c0_72 = arith.constant 0 : index
    %c0_73 = arith.constant 0 : index
    %c0_74 = arith.constant 0 : index
    %89 = vector.load %arg6[%c0_71, %c0_72, %c0_73, %c0_74] : memref<3x3x16x16xbf16, #tpu.memory_space<vmem>>, vector<1x1x16x16xbf16>
    %90 = vector.shape_cast %89 : vector<1x1x16x16xbf16> to vector<16x16xbf16>
    %cst_75 = arith.constant dense<0.000000e+00> : vector<32x16xf32>
    %91 = tpu.matmul %88, %90, %cst_75 {dimension_numbers = #tpu.dot_dimension_numbers<[1], [0], [0], [1], [0, 0, 1, 1], [], []>} : vector<32x16xbf16>, vector<16x16xbf16>, vector<32x16xf32> -> vector<32x16xf32>
    "tpu.trace_start"() <{level = 10 : i32, message = "buv,bvf->buf"}> : () -> ()
    %cst_76 = arith.constant dense<0.000000e+00> : vector<2x16x16xf32>
    %92 = tpu.matmul %82, %86, %cst_76 {dimension_numbers = #tpu.dot_dimension_numbers<[2], [1], [1], [2], [0, 0, 0, 1, 1, 2], [0], [0]>} : vector<2x16x16xf32>, vector<2x16x16xf32>, vector<2x16x16xf32> -> vector<2x16x16xf32>
    "tpu.trace_stop"() : () -> ()
    %93 = vector.shape_cast %92 : vector<2x16x16xf32> to vector<32x16xf32>
    %94 = arith.truncf %93 : vector<32x16xf32> to vector<32x16xbf16>
    %c0_77 = arith.constant 0 : index
    %c1_78 = arith.constant 1 : index
    %c0_79 = arith.constant 0 : index
    %c0_80 = arith.constant 0 : index
    %95 = vector.load %arg6[%c0_77, %c1_78, %c0_79, %c0_80] : memref<3x3x16x16xbf16, #tpu.memory_space<vmem>>, vector<1x1x16x16xbf16>
    %96 = vector.shape_cast %95 : vector<1x1x16x16xbf16> to vector<16x16xbf16>
    %cst_81 = arith.constant dense<0.000000e+00> : vector<32x16xf32>
    %97 = tpu.matmul %94, %96, %cst_81 {dimension_numbers = #tpu.dot_dimension_numbers<[1], [0], [0], [1], [0, 0, 1, 1], [], []>} : vector<32x16xbf16>, vector<16x16xbf16>, vector<32x16xf32> -> vector<32x16xf32>
    %98 = arith.addf %91, %97 : vector<32x16xf32>
    "tpu.trace_start"() <{level = 10 : i32, message = "buv,bvf->buf"}> : () -> ()
    %cst_82 = arith.constant dense<0.000000e+00> : vector<2x16x16xf32>
    %99 = tpu.matmul %82, %92, %cst_82 {dimension_numbers = #tpu.dot_dimension_numbers<[2], [1], [1], [2], [0, 0, 0, 1, 1, 2], [0], [0]>} : vector<2x16x16xf32>, vector<2x16x16xf32>, vector<2x16x16xf32> -> vector<2x16x16xf32>
    "tpu.trace_stop"() : () -> ()
    %cst_83 = arith.constant 2.000000e+00 : f32
    %100 = vector.broadcast %cst_83 : f32 to vector<2x16x16xf32>
    %101 = arith.mulf %100, %99 : vector<2x16x16xf32>
    %102 = arith.subf %101, %86 : vector<2x16x16xf32>
    %103 = vector.shape_cast %102 : vector<2x16x16xf32> to vector<32x16xf32>
    %104 = arith.truncf %103 : vector<32x16xf32> to vector<32x16xbf16>
    %c0_84 = arith.constant 0 : index
    %c2_85 = arith.constant 2 : index
    %c0_86 = arith.constant 0 : index
    %c0_87 = arith.constant 0 : index
    %105 = vector.load %arg6[%c0_84, %c2_85, %c0_86, %c0_87] : memref<3x3x16x16xbf16, #tpu.memory_space<vmem>>, vector<1x1x16x16xbf16>
    %106 = vector.shape_cast %105 : vector<1x1x16x16xbf16> to vector<16x16xbf16>
    %cst_88 = arith.constant dense<0.000000e+00> : vector<32x16xf32>
    %107 = tpu.matmul %104, %106, %cst_88 {dimension_numbers = #tpu.dot_dimension_numbers<[1], [0], [0], [1], [0, 0, 1, 1], [], []>} : vector<32x16xbf16>, vector<16x16xbf16>, vector<32x16xf32> -> vector<32x16xf32>
    %108 = arith.addf %98, %107 : vector<32x16xf32>
    %109 = vector.shape_cast %75 : vector<32x16xf32> to vector<2x16x16xf32>
    %110 = vector.shape_cast %109 : vector<2x16x16xf32> to vector<32x16xf32>
    %111 = arith.truncf %110 : vector<32x16xf32> to vector<32x16xbf16>
    %c1_89 = arith.constant 1 : index
    %c0_90 = arith.constant 0 : index
    %c0_91 = arith.constant 0 : index
    %c0_92 = arith.constant 0 : index
    %112 = vector.load %arg6[%c1_89, %c0_90, %c0_91, %c0_92] : memref<3x3x16x16xbf16, #tpu.memory_space<vmem>>, vector<1x1x16x16xbf16>
    %113 = vector.shape_cast %112 : vector<1x1x16x16xbf16> to vector<16x16xbf16>
    %cst_93 = arith.constant dense<0.000000e+00> : vector<32x16xf32>
    %114 = tpu.matmul %111, %113, %cst_93 {dimension_numbers = #tpu.dot_dimension_numbers<[1], [0], [0], [1], [0, 0, 1, 1], [], []>} : vector<32x16xbf16>, vector<16x16xbf16>, vector<32x16xf32> -> vector<32x16xf32>
    %115 = arith.addf %108, %114 : vector<32x16xf32>
    "tpu.trace_start"() <{level = 10 : i32, message = "buv,bvf->buf"}> : () -> ()
    %cst_94 = arith.constant dense<0.000000e+00> : vector<2x16x16xf32>
    %116 = tpu.matmul %82, %109, %cst_94 {dimension_numbers = #tpu.dot_dimension_numbers<[2], [1], [1], [2], [0, 0, 0, 1, 1, 2], [0], [0]>} : vector<2x16x16xf32>, vector<2x16x16xf32>, vector<2x16x16xf32> -> vector<2x16x16xf32>
    "tpu.trace_stop"() : () -> ()
    %117 = vector.shape_cast %116 : vector<2x16x16xf32> to vector<32x16xf32>
    %118 = arith.truncf %117 : vector<32x16xf32> to vector<32x16xbf16>
    %c1_95 = arith.constant 1 : index
    %c1_96 = arith.constant 1 : index
    %c0_97 = arith.constant 0 : index
    %c0_98 = arith.constant 0 : index
    %119 = vector.load %arg6[%c1_95, %c1_96, %c0_97, %c0_98] : memref<3x3x16x16xbf16, #tpu.memory_space<vmem>>, vector<1x1x16x16xbf16>
    %120 = vector.shape_cast %119 : vector<1x1x16x16xbf16> to vector<16x16xbf16>
    %cst_99 = arith.constant dense<0.000000e+00> : vector<32x16xf32>
    %121 = tpu.matmul %118, %120, %cst_99 {dimension_numbers = #tpu.dot_dimension_numbers<[1], [0], [0], [1], [0, 0, 1, 1], [], []>} : vector<32x16xbf16>, vector<16x16xbf16>, vector<32x16xf32> -> vector<32x16xf32>
    %122 = arith.addf %115, %121 : vector<32x16xf32>
    "tpu.trace_start"() <{level = 10 : i32, message = "buv,bvf->buf"}> : () -> ()
    %cst_100 = arith.constant dense<0.000000e+00> : vector<2x16x16xf32>
    %123 = tpu.matmul %82, %116, %cst_100 {dimension_numbers = #tpu.dot_dimension_numbers<[2], [1], [1], [2], [0, 0, 0, 1, 1, 2], [0], [0]>} : vector<2x16x16xf32>, vector<2x16x16xf32>, vector<2x16x16xf32> -> vector<2x16x16xf32>
    "tpu.trace_stop"() : () -> ()
    %cst_101 = arith.constant 2.000000e+00 : f32
    %124 = vector.broadcast %cst_101 : f32 to vector<2x16x16xf32>
    %125 = arith.mulf %124, %123 : vector<2x16x16xf32>
    %126 = arith.subf %125, %109 : vector<2x16x16xf32>
    %127 = vector.shape_cast %126 : vector<2x16x16xf32> to vector<32x16xf32>
    %128 = arith.truncf %127 : vector<32x16xf32> to vector<32x16xbf16>
    %c1_102 = arith.constant 1 : index
    %c2_103 = arith.constant 2 : index
    %c0_104 = arith.constant 0 : index
    %c0_105 = arith.constant 0 : index
    %129 = vector.load %arg6[%c1_102, %c2_103, %c0_104, %c0_105] : memref<3x3x16x16xbf16, #tpu.memory_space<vmem>>, vector<1x1x16x16xbf16>
    %130 = vector.shape_cast %129 : vector<1x1x16x16xbf16> to vector<16x16xbf16>
    %cst_106 = arith.constant dense<0.000000e+00> : vector<32x16xf32>
    %131 = tpu.matmul %128, %130, %cst_106 {dimension_numbers = #tpu.dot_dimension_numbers<[1], [0], [0], [1], [0, 0, 1, 1], [], []>} : vector<32x16xbf16>, vector<16x16xbf16>, vector<32x16xf32> -> vector<32x16xf32>
    %132 = arith.addf %122, %131 : vector<32x16xf32>
    %133 = vector.shape_cast %76 : vector<32x16xf32> to vector<2x16x16xf32>
    %134 = vector.shape_cast %133 : vector<2x16x16xf32> to vector<32x16xf32>
    %135 = arith.truncf %134 : vector<32x16xf32> to vector<32x16xbf16>
    %c2_107 = arith.constant 2 : index
    %c0_108 = arith.constant 0 : index
    %c0_109 = arith.constant 0 : index
    %c0_110 = arith.constant 0 : index
    %136 = vector.load %arg6[%c2_107, %c0_108, %c0_109, %c0_110] : memref<3x3x16x16xbf16, #tpu.memory_space<vmem>>, vector<1x1x16x16xbf16>
    %137 = vector.shape_cast %136 : vector<1x1x16x16xbf16> to vector<16x16xbf16>
    %cst_111 = arith.constant dense<0.000000e+00> : vector<32x16xf32>
    %138 = tpu.matmul %135, %137, %cst_111 {dimension_numbers = #tpu.dot_dimension_numbers<[1], [0], [0], [1], [0, 0, 1, 1], [], []>} : vector<32x16xbf16>, vector<16x16xbf16>, vector<32x16xf32> -> vector<32x16xf32>
    %139 = arith.addf %132, %138 : vector<32x16xf32>
    "tpu.trace_start"() <{level = 10 : i32, message = "buv,bvf->buf"}> : () -> ()
    %cst_112 = arith.constant dense<0.000000e+00> : vector<2x16x16xf32>
    %140 = tpu.matmul %82, %133, %cst_112 {dimension_numbers = #tpu.dot_dimension_numbers<[2], [1], [1], [2], [0, 0, 0, 1, 1, 2], [0], [0]>} : vector<2x16x16xf32>, vector<2x16x16xf32>, vector<2x16x16xf32> -> vector<2x16x16xf32>
    "tpu.trace_stop"() : () -> ()
    %141 = vector.shape_cast %140 : vector<2x16x16xf32> to vector<32x16xf32>
    %142 = arith.truncf %141 : vector<32x16xf32> to vector<32x16xbf16>
    %c2_113 = arith.constant 2 : index
    %c1_114 = arith.constant 1 : index
    %c0_115 = arith.constant 0 : index
    %c0_116 = arith.constant 0 : index
    %143 = vector.load %arg6[%c2_113, %c1_114, %c0_115, %c0_116] : memref<3x3x16x16xbf16, #tpu.memory_space<vmem>>, vector<1x1x16x16xbf16>
    %144 = vector.shape_cast %143 : vector<1x1x16x16xbf16> to vector<16x16xbf16>
    %cst_117 = arith.constant dense<0.000000e+00> : vector<32x16xf32>
    %145 = tpu.matmul %142, %144, %cst_117 {dimension_numbers = #tpu.dot_dimension_numbers<[1], [0], [0], [1], [0, 0, 1, 1], [], []>} : vector<32x16xbf16>, vector<16x16xbf16>, vector<32x16xf32> -> vector<32x16xf32>
    %146 = arith.addf %139, %145 : vector<32x16xf32>
    "tpu.trace_start"() <{level = 10 : i32, message = "buv,bvf->buf"}> : () -> ()
    %cst_118 = arith.constant dense<0.000000e+00> : vector<2x16x16xf32>
    %147 = tpu.matmul %82, %140, %cst_118 {dimension_numbers = #tpu.dot_dimension_numbers<[2], [1], [1], [2], [0, 0, 0, 1, 1, 2], [0], [0]>} : vector<2x16x16xf32>, vector<2x16x16xf32>, vector<2x16x16xf32> -> vector<2x16x16xf32>
    "tpu.trace_stop"() : () -> ()
    %cst_119 = arith.constant 2.000000e+00 : f32
    %148 = vector.broadcast %cst_119 : f32 to vector<2x16x16xf32>
    %149 = arith.mulf %148, %147 : vector<2x16x16xf32>
    %150 = arith.subf %149, %133 : vector<2x16x16xf32>
    %151 = vector.shape_cast %150 : vector<2x16x16xf32> to vector<32x16xf32>
    %152 = arith.truncf %151 : vector<32x16xf32> to vector<32x16xbf16>
    %c2_120 = arith.constant 2 : index
    %c2_121 = arith.constant 2 : index
    %c0_122 = arith.constant 0 : index
    %c0_123 = arith.constant 0 : index
    %153 = vector.load %arg6[%c2_120, %c2_121, %c0_122, %c0_123] : memref<3x3x16x16xbf16, #tpu.memory_space<vmem>>, vector<1x1x16x16xbf16>
    %154 = vector.shape_cast %153 : vector<1x1x16x16xbf16> to vector<16x16xbf16>
    %cst_124 = arith.constant dense<0.000000e+00> : vector<32x16xf32>
    %155 = tpu.matmul %152, %154, %cst_124 {dimension_numbers = #tpu.dot_dimension_numbers<[1], [0], [0], [1], [0, 0, 1, 1], [], []>} : vector<32x16xbf16>, vector<16x16xbf16>, vector<32x16xf32> -> vector<32x16xf32>
    %156 = arith.addf %146, %155 : vector<32x16xf32>
    %157 = vector.shape_cast %156 : vector<32x16xf32> to vector<2x16x16xf32>
    %c0_125 = arith.constant 0 : index
    %c0_126 = arith.constant 0 : index
    %c0_127 = arith.constant 0 : index
    %158 = vector.load %arg8[%c0_125, %c0_126, %c0_127] : memref<1x16x16xf32, #tpu.memory_space<vmem>>, vector<1x16x16xf32>
    %159 = vector.broadcast %158 : vector<1x16x16xf32> to vector<2x16x16xf32>
    %160 = arith.addf %157, %159 : vector<2x16x16xf32>
    %161 = vector.shape_cast %77 : vector<32x16xf32> to vector<2x16x16xf32>
    %162 = vector.shape_cast %161 : vector<2x16x16xf32> to vector<32x16xf32>
    %163 = arith.truncf %162 : vector<32x16xf32> to vector<32x16xbf16>
    %c0_128 = arith.constant 0 : index
    %c0_129 = arith.constant 0 : index
    %c0_130 = arith.constant 0 : index
    %c0_131 = arith.constant 0 : index
    %164 = vector.load %arg7[%c0_128, %c0_129, %c0_130, %c0_131] : memref<3x3x16x16xbf16, #tpu.memory_space<vmem>>, vector<1x1x16x16xbf16>
    %165 = vector.shape_cast %164 : vector<1x1x16x16xbf16> to vector<16x16xbf16>
    %cst_132 = arith.constant dense<0.000000e+00> : vector<32x16xf32>
    %166 = tpu.matmul %163, %165, %cst_132 {dimension_numbers = #tpu.dot_dimension_numbers<[1], [0], [0], [1], [0, 0, 1, 1], [], []>} : vector<32x16xbf16>, vector<16x16xbf16>, vector<32x16xf32> -> vector<32x16xf32>
    "tpu.trace_start"() <{level = 10 : i32, message = "buv,bvf->buf"}> : () -> ()
    %cst_133 = arith.constant dense<0.000000e+00> : vector<2x16x16xf32>
    %167 = tpu.matmul %85, %161, %cst_133 {dimension_numbers = #tpu.dot_dimension_numbers<[2], [1], [1], [2], [0, 0, 0, 1, 1, 2], [0], [0]>} : vector<2x16x16xf32>, vector<2x16x16xf32>, vector<2x16x16xf32> -> vector<2x16x16xf32>
    "tpu.trace_stop"() : () -> ()
    %168 = vector.shape_cast %167 : vector<2x16x16xf32> to vector<32x16xf32>
    %169 = arith.truncf %168 : vector<32x16xf32> to vector<32x16xbf16>
    %c0_134 = arith.constant 0 : index
    %c1_135 = arith.constant 1 : index
    %c0_136 = arith.constant 0 : index
    %c0_137 = arith.constant 0 : index
    %170 = vector.load %arg7[%c0_134, %c1_135, %c0_136, %c0_137] : memref<3x3x16x16xbf16, #tpu.memory_space<vmem>>, vector<1x1x16x16xbf16>
    %171 = vector.shape_cast %170 : vector<1x1x16x16xbf16> to vector<16x16xbf16>
    %cst_138 = arith.constant dense<0.000000e+00> : vector<32x16xf32>
    %172 = tpu.matmul %169, %171, %cst_138 {dimension_numbers = #tpu.dot_dimension_numbers<[1], [0], [0], [1], [0, 0, 1, 1], [], []>} : vector<32x16xbf16>, vector<16x16xbf16>, vector<32x16xf32> -> vector<32x16xf32>
    %173 = arith.addf %166, %172 : vector<32x16xf32>
    "tpu.trace_start"() <{level = 10 : i32, message = "buv,bvf->buf"}> : () -> ()
    %cst_139 = arith.constant dense<0.000000e+00> : vector<2x16x16xf32>
    %174 = tpu.matmul %85, %167, %cst_139 {dimension_numbers = #tpu.dot_dimension_numbers<[2], [1], [1], [2], [0, 0, 0, 1, 1, 2], [0], [0]>} : vector<2x16x16xf32>, vector<2x16x16xf32>, vector<2x16x16xf32> -> vector<2x16x16xf32>
    "tpu.trace_stop"() : () -> ()
    %cst_140 = arith.constant 2.000000e+00 : f32
    %175 = vector.broadcast %cst_140 : f32 to vector<2x16x16xf32>
    %176 = arith.mulf %175, %174 : vector<2x16x16xf32>
    %177 = arith.subf %176, %161 : vector<2x16x16xf32>
    %178 = vector.shape_cast %177 : vector<2x16x16xf32> to vector<32x16xf32>
    %179 = arith.truncf %178 : vector<32x16xf32> to vector<32x16xbf16>
    %c0_141 = arith.constant 0 : index
    %c2_142 = arith.constant 2 : index
    %c0_143 = arith.constant 0 : index
    %c0_144 = arith.constant 0 : index
    %180 = vector.load %arg7[%c0_141, %c2_142, %c0_143, %c0_144] : memref<3x3x16x16xbf16, #tpu.memory_space<vmem>>, vector<1x1x16x16xbf16>
    %181 = vector.shape_cast %180 : vector<1x1x16x16xbf16> to vector<16x16xbf16>
    %cst_145 = arith.constant dense<0.000000e+00> : vector<32x16xf32>
    %182 = tpu.matmul %179, %181, %cst_145 {dimension_numbers = #tpu.dot_dimension_numbers<[1], [0], [0], [1], [0, 0, 1, 1], [], []>} : vector<32x16xbf16>, vector<16x16xbf16>, vector<32x16xf32> -> vector<32x16xf32>
    %183 = arith.addf %173, %182 : vector<32x16xf32>
    %184 = vector.shape_cast %78 : vector<32x16xf32> to vector<2x16x16xf32>
    %185 = vector.shape_cast %184 : vector<2x16x16xf32> to vector<32x16xf32>
    %186 = arith.truncf %185 : vector<32x16xf32> to vector<32x16xbf16>
    %c1_146 = arith.constant 1 : index
    %c0_147 = arith.constant 0 : index
    %c0_148 = arith.constant 0 : index
    %c0_149 = arith.constant 0 : index
    %187 = vector.load %arg7[%c1_146, %c0_147, %c0_148, %c0_149] : memref<3x3x16x16xbf16, #tpu.memory_space<vmem>>, vector<1x1x16x16xbf16>
    %188 = vector.shape_cast %187 : vector<1x1x16x16xbf16> to vector<16x16xbf16>
    %cst_150 = arith.constant dense<0.000000e+00> : vector<32x16xf32>
    %189 = tpu.matmul %186, %188, %cst_150 {dimension_numbers = #tpu.dot_dimension_numbers<[1], [0], [0], [1], [0, 0, 1, 1], [], []>} : vector<32x16xbf16>, vector<16x16xbf16>, vector<32x16xf32> -> vector<32x16xf32>
    %190 = arith.addf %183, %189 : vector<32x16xf32>
    "tpu.trace_start"() <{level = 10 : i32, message = "buv,bvf->buf"}> : () -> ()
    %cst_151 = arith.constant dense<0.000000e+00> : vector<2x16x16xf32>
    %191 = tpu.matmul %85, %184, %cst_151 {dimension_numbers = #tpu.dot_dimension_numbers<[2], [1], [1], [2], [0, 0, 0, 1, 1, 2], [0], [0]>} : vector<2x16x16xf32>, vector<2x16x16xf32>, vector<2x16x16xf32> -> vector<2x16x16xf32>
    "tpu.trace_stop"() : () -> ()
    %192 = vector.shape_cast %191 : vector<2x16x16xf32> to vector<32x16xf32>
    %193 = arith.truncf %192 : vector<32x16xf32> to vector<32x16xbf16>
    %c1_152 = arith.constant 1 : index
    %c1_153 = arith.constant 1 : index
    %c0_154 = arith.constant 0 : index
    %c0_155 = arith.constant 0 : index
    %194 = vector.load %arg7[%c1_152, %c1_153, %c0_154, %c0_155] : memref<3x3x16x16xbf16, #tpu.memory_space<vmem>>, vector<1x1x16x16xbf16>
    %195 = vector.shape_cast %194 : vector<1x1x16x16xbf16> to vector<16x16xbf16>
    %cst_156 = arith.constant dense<0.000000e+00> : vector<32x16xf32>
    %196 = tpu.matmul %193, %195, %cst_156 {dimension_numbers = #tpu.dot_dimension_numbers<[1], [0], [0], [1], [0, 0, 1, 1], [], []>} : vector<32x16xbf16>, vector<16x16xbf16>, vector<32x16xf32> -> vector<32x16xf32>
    %197 = arith.addf %190, %196 : vector<32x16xf32>
    "tpu.trace_start"() <{level = 10 : i32, message = "buv,bvf->buf"}> : () -> ()
    %cst_157 = arith.constant dense<0.000000e+00> : vector<2x16x16xf32>
    %198 = tpu.matmul %85, %191, %cst_157 {dimension_numbers = #tpu.dot_dimension_numbers<[2], [1], [1], [2], [0, 0, 0, 1, 1, 2], [0], [0]>} : vector<2x16x16xf32>, vector<2x16x16xf32>, vector<2x16x16xf32> -> vector<2x16x16xf32>
    "tpu.trace_stop"() : () -> ()
    %cst_158 = arith.constant 2.000000e+00 : f32
    %199 = vector.broadcast %cst_158 : f32 to vector<2x16x16xf32>
    %200 = arith.mulf %199, %198 : vector<2x16x16xf32>
    %201 = arith.subf %200, %184 : vector<2x16x16xf32>
    %202 = vector.shape_cast %201 : vector<2x16x16xf32> to vector<32x16xf32>
    %203 = arith.truncf %202 : vector<32x16xf32> to vector<32x16xbf16>
    %c1_159 = arith.constant 1 : index
    %c2_160 = arith.constant 2 : index
    %c0_161 = arith.constant 0 : index
    %c0_162 = arith.constant 0 : index
    %204 = vector.load %arg7[%c1_159, %c2_160, %c0_161, %c0_162] : memref<3x3x16x16xbf16, #tpu.memory_space<vmem>>, vector<1x1x16x16xbf16>
    %205 = vector.shape_cast %204 : vector<1x1x16x16xbf16> to vector<16x16xbf16>
    %cst_163 = arith.constant dense<0.000000e+00> : vector<32x16xf32>
    %206 = tpu.matmul %203, %205, %cst_163 {dimension_numbers = #tpu.dot_dimension_numbers<[1], [0], [0], [1], [0, 0, 1, 1], [], []>} : vector<32x16xbf16>, vector<16x16xbf16>, vector<32x16xf32> -> vector<32x16xf32>
    %207 = arith.addf %197, %206 : vector<32x16xf32>
    %208 = vector.shape_cast %79 : vector<32x16xf32> to vector<2x16x16xf32>
    %209 = vector.shape_cast %208 : vector<2x16x16xf32> to vector<32x16xf32>
    %210 = arith.truncf %209 : vector<32x16xf32> to vector<32x16xbf16>
    %c2_164 = arith.constant 2 : index
    %c0_165 = arith.constant 0 : index
    %c0_166 = arith.constant 0 : index
    %c0_167 = arith.constant 0 : index
    %211 = vector.load %arg7[%c2_164, %c0_165, %c0_166, %c0_167] : memref<3x3x16x16xbf16, #tpu.memory_space<vmem>>, vector<1x1x16x16xbf16>
    %212 = vector.shape_cast %211 : vector<1x1x16x16xbf16> to vector<16x16xbf16>
    %cst_168 = arith.constant dense<0.000000e+00> : vector<32x16xf32>
    %213 = tpu.matmul %210, %212, %cst_168 {dimension_numbers = #tpu.dot_dimension_numbers<[1], [0], [0], [1], [0, 0, 1, 1], [], []>} : vector<32x16xbf16>, vector<16x16xbf16>, vector<32x16xf32> -> vector<32x16xf32>
    %214 = arith.addf %207, %213 : vector<32x16xf32>
    "tpu.trace_start"() <{level = 10 : i32, message = "buv,bvf->buf"}> : () -> ()
    %cst_169 = arith.constant dense<0.000000e+00> : vector<2x16x16xf32>
    %215 = tpu.matmul %85, %208, %cst_169 {dimension_numbers = #tpu.dot_dimension_numbers<[2], [1], [1], [2], [0, 0, 0, 1, 1, 2], [0], [0]>} : vector<2x16x16xf32>, vector<2x16x16xf32>, vector<2x16x16xf32> -> vector<2x16x16xf32>
    "tpu.trace_stop"() : () -> ()
    %216 = vector.shape_cast %215 : vector<2x16x16xf32> to vector<32x16xf32>
    %217 = arith.truncf %216 : vector<32x16xf32> to vector<32x16xbf16>
    %c2_170 = arith.constant 2 : index
    %c1_171 = arith.constant 1 : index
    %c0_172 = arith.constant 0 : index
    %c0_173 = arith.constant 0 : index
    %218 = vector.load %arg7[%c2_170, %c1_171, %c0_172, %c0_173] : memref<3x3x16x16xbf16, #tpu.memory_space<vmem>>, vector<1x1x16x16xbf16>
    %219 = vector.shape_cast %218 : vector<1x1x16x16xbf16> to vector<16x16xbf16>
    %cst_174 = arith.constant dense<0.000000e+00> : vector<32x16xf32>
    %220 = tpu.matmul %217, %219, %cst_174 {dimension_numbers = #tpu.dot_dimension_numbers<[1], [0], [0], [1], [0, 0, 1, 1], [], []>} : vector<32x16xbf16>, vector<16x16xbf16>, vector<32x16xf32> -> vector<32x16xf32>
    %221 = arith.addf %214, %220 : vector<32x16xf32>
    "tpu.trace_start"() <{level = 10 : i32, message = "buv,bvf->buf"}> : () -> ()
    %cst_175 = arith.constant dense<0.000000e+00> : vector<2x16x16xf32>
    %222 = tpu.matmul %85, %215, %cst_175 {dimension_numbers = #tpu.dot_dimension_numbers<[2], [1], [1], [2], [0, 0, 0, 1, 1, 2], [0], [0]>} : vector<2x16x16xf32>, vector<2x16x16xf32>, vector<2x16x16xf32> -> vector<2x16x16xf32>
    "tpu.trace_stop"() : () -> ()
    %cst_176 = arith.constant 2.000000e+00 : f32
    %223 = vector.broadcast %cst_176 : f32 to vector<2x16x16xf32>
    %224 = arith.mulf %223, %222 : vector<2x16x16xf32>
    %225 = arith.subf %224, %208 : vector<2x16x16xf32>
    %226 = vector.shape_cast %225 : vector<2x16x16xf32> to vector<32x16xf32>
    %227 = arith.truncf %226 : vector<32x16xf32> to vector<32x16xbf16>
    %c2_177 = arith.constant 2 : index
    %c2_178 = arith.constant 2 : index
    %c0_179 = arith.constant 0 : index
    %c0_180 = arith.constant 0 : index
    %228 = vector.load %arg7[%c2_177, %c2_178, %c0_179, %c0_180] : memref<3x3x16x16xbf16, #tpu.memory_space<vmem>>, vector<1x1x16x16xbf16>
    %229 = vector.shape_cast %228 : vector<1x1x16x16xbf16> to vector<16x16xbf16>
    %cst_181 = arith.constant dense<0.000000e+00> : vector<32x16xf32>
    %230 = tpu.matmul %227, %229, %cst_181 {dimension_numbers = #tpu.dot_dimension_numbers<[1], [0], [0], [1], [0, 0, 1, 1], [], []>} : vector<32x16xbf16>, vector<16x16xbf16>, vector<32x16xf32> -> vector<32x16xf32>
    %231 = arith.addf %221, %230 : vector<32x16xf32>
    %232 = vector.shape_cast %231 : vector<32x16xf32> to vector<2x16x16xf32>
    %c0_182 = arith.constant 0 : index
    %c0_183 = arith.constant 0 : index
    %c0_184 = arith.constant 0 : index
    %233 = vector.load %arg9[%c0_182, %c0_183, %c0_184] : memref<1x16x16xf32, #tpu.memory_space<vmem>>, vector<1x16x16xf32>
    %234 = vector.broadcast %233 : vector<1x16x16xf32> to vector<2x16x16xf32>
    %235 = arith.addf %232, %234 : vector<2x16x16xf32>
    %cst_185 = arith.constant 0.000000e+00 : f32
    %236 = vector.broadcast %cst_185 : f32 to vector<2x16x16xf32>
    %237 = arith.cmpf oge, %160, %236 : vector<2x16x16xf32>
    %cst_186 = arith.constant 0.00999999977 : f32
    %238 = vector.broadcast %cst_186 : f32 to vector<2x16x16xf32>
    %239 = arith.mulf %238, %160 : vector<2x16x16xf32>
    %240 = arith.select %237, %160, %239 : vector<2x16x16xi1>, vector<2x16x16xf32>
    %cst_187 = arith.constant 0.000000e+00 : f32
    %241 = vector.broadcast %cst_187 : f32 to vector<2x16x16xf32>
    %242 = arith.cmpf oge, %235, %241 : vector<2x16x16xf32>
    %cst_188 = arith.constant 0.00999999977 : f32
    %243 = vector.broadcast %cst_188 : f32 to vector<2x16x16xf32>
    %244 = arith.mulf %243, %235 : vector<2x16x16xf32>
    %245 = arith.select %242, %235, %244 : vector<2x16x16xi1>, vector<2x16x16xf32>
    %c0_189 = arith.constant 0 : index
    %c0_190 = arith.constant 0 : index
    %246 = vector.load %arg10[%c0_189, %c0_190] : memref<32x32xbf16, #tpu.memory_space<vmem>>, vector<32x32xbf16>
    %247 = vector.shape_cast %240 : vector<2x16x16xf32> to vector<32x16xf32>
    %248 = arith.truncf %247 : vector<32x16xf32> to vector<32x16xbf16>
    %249 = vector.extract_strided_slice %246 {offsets = [0, 0], sizes = [16, 32], strides = [1, 1]} : vector<32x32xbf16> to vector<16x32xbf16>
    %cst_191 = arith.constant dense<0.000000e+00> : vector<32x32xf32>
    %250 = tpu.matmul %248, %249, %cst_191 {dimension_numbers = #tpu.dot_dimension_numbers<[1], [0], [0], [1], [0, 0, 1, 1], [], []>} : vector<32x16xbf16>, vector<16x32xbf16>, vector<32x32xf32> -> vector<32x32xf32>
    %251 = vector.shape_cast %245 : vector<2x16x16xf32> to vector<32x16xf32>
    %252 = arith.truncf %251 : vector<32x16xf32> to vector<32x16xbf16>
    %253 = vector.extract_strided_slice %246 {offsets = [16, 0], sizes = [16, 32], strides = [1, 1]} : vector<32x32xbf16> to vector<16x32xbf16>
    %cst_192 = arith.constant dense<0.000000e+00> : vector<32x32xf32>
    %254 = tpu.matmul %252, %253, %cst_192 {dimension_numbers = #tpu.dot_dimension_numbers<[1], [0], [0], [1], [0, 0, 1, 1], [], []>} : vector<32x16xbf16>, vector<16x32xbf16>, vector<32x32xf32> -> vector<32x32xf32>
    %255 = arith.addf %250, %254 : vector<32x32xf32>
    %256 = vector.shape_cast %255 : vector<32x32xf32> to vector<2x16x32xf32>
    %c0_193 = arith.constant 0 : index
    %c0_194 = arith.constant 0 : index
    %c0_195 = arith.constant 0 : index
    %257 = vector.load %arg11[%c0_193, %c0_194, %c0_195] : memref<1x16x32xf32, #tpu.memory_space<vmem>>, vector<1x16x32xf32>
    %258 = vector.broadcast %257 : vector<1x16x32xf32> to vector<2x16x32xf32>
    %259 = arith.addf %256, %258 : vector<2x16x32xf32>
    %260 = math.tanh %259 : vector<2x16x32xf32>
    %c0_196 = arith.constant 0 : index
    %c0_197 = arith.constant 0 : index
    %c0_198 = arith.constant 0 : index
    %261 = vector.load %arg13[%c0_196, %c0_197, %c0_198] : memref<1x1x32xf32, #tpu.memory_space<vmem>>, vector<1x1x32xf32>
    %c0_199 = arith.constant 0 : index
    %c0_200 = arith.constant 0 : index
    %c0_201 = arith.constant 0 : index
    %c0_202 = arith.constant 0 : index
    %262 = vector.load %arg12[%c0_199, %c0_200, %c0_201, %c0_202] : memref<3x1x16x32xf32, #tpu.memory_space<vmem>>, vector<1x1x16x32xf32>
    %263 = vector.shape_cast %262 : vector<1x1x16x32xf32> to vector<1x16x32xf32>
    %264 = vector.broadcast %263 : vector<1x16x32xf32> to vector<2x16x32xf32>
    %265 = arith.addf %2, %264 : vector<2x16x32xf32>
    %c1_203 = arith.constant 1 : index
    %c0_204 = arith.constant 0 : index
    %c0_205 = arith.constant 0 : index
    %c0_206 = arith.constant 0 : index
    %266 = vector.load %arg12[%c1_203, %c0_204, %c0_205, %c0_206] : memref<3x1x16x32xf32, #tpu.memory_space<vmem>>, vector<1x1x16x32xf32>
    %267 = vector.shape_cast %266 : vector<1x1x16x32xf32> to vector<1x16x32xf32>
    %268 = vector.broadcast %267 : vector<1x16x32xf32> to vector<2x16x32xf32>
    %269 = arith.addf %4, %268 : vector<2x16x32xf32>
    %c2_207 = arith.constant 2 : index
    %c0_208 = arith.constant 0 : index
    %c0_209 = arith.constant 0 : index
    %c0_210 = arith.constant 0 : index
    %270 = vector.load %arg12[%c2_207, %c0_208, %c0_209, %c0_210] : memref<3x1x16x32xf32, #tpu.memory_space<vmem>>, vector<1x1x16x32xf32>
    %271 = vector.shape_cast %270 : vector<1x1x16x32xf32> to vector<1x16x32xf32>
    %272 = vector.broadcast %271 : vector<1x16x32xf32> to vector<2x16x32xf32>
    %273 = arith.addf %6, %272 : vector<2x16x32xf32>
    %c0_211 = arith.constant 0 : index
    %c0_212 = arith.constant 0 : index
    %c0_213 = arith.constant 0 : index
    %274 = vector.load %arg14[%c0_211, %c0_212, %c0_213] : memref<1x1x16xf32, #tpu.memory_space<vmem>>, vector<1x1x16xf32>
    %275 = vector.broadcast %274 : vector<1x1x16xf32> to vector<2x16x16xf32>
    %276 = arith.mulf %240, %275 : vector<2x16x16xf32>
    %cst_214 = arith.constant dense<0.000000e+00> : vector<2x16xf32>
    %277 = vector.multi_reduction <add>, %276, %cst_214 [2] : vector<2x16x16xf32> to vector<2x16xf32>
    %278 = vector.shape_cast %277 : vector<2x16xf32> to vector<2x16x1xf32>
    %c0_215 = arith.constant 0 : index
    %c0_216 = arith.constant 0 : index
    %c0_217 = arith.constant 0 : index
    %279 = vector.load %arg15[%c0_215, %c0_216, %c0_217] : memref<1x1x16xf32, #tpu.memory_space<vmem>>, vector<1x1x16xf32>
    %280 = vector.broadcast %279 : vector<1x1x16xf32> to vector<2x16x16xf32>
    %281 = arith.mulf %245, %280 : vector<2x16x16xf32>
    %cst_218 = arith.constant dense<0.000000e+00> : vector<2x16xf32>
    %282 = vector.multi_reduction <add>, %281, %cst_218 [2] : vector<2x16x16xf32> to vector<2x16xf32>
    %283 = vector.shape_cast %282 : vector<2x16xf32> to vector<2x16x1xf32>
    %284 = arith.addf %278, %283 : vector<2x16x1xf32>
    %c0_219 = arith.constant 0 : index
    %285 = memref.load %arg16[%c0_219] : memref<1xf32, #tpu.memory_space<smem>>
    %286 = vector.broadcast %285 : f32 to vector<2x16x1xf32>
    %287 = arith.addf %284, %286 : vector<2x16x1xf32>
    %288 = vector.broadcast %261 : vector<1x1x32xf32> to vector<2x16x32xf32>
    %289 = arith.mulf %265, %288 : vector<2x16x32xf32>
    %cst_220 = arith.constant dense<0.000000e+00> : vector<2x16xf32>
    %290 = vector.multi_reduction <add>, %289, %cst_220 [2] : vector<2x16x32xf32> to vector<2x16xf32>
    %291 = vector.shape_cast %290 : vector<2x16xf32> to vector<2x16x1xf32>
    %292 = arith.addf %291, %287 : vector<2x16x1xf32>
    %293 = vector.broadcast %261 : vector<1x1x32xf32> to vector<2x16x32xf32>
    %294 = arith.mulf %269, %293 : vector<2x16x32xf32>
    %cst_221 = arith.constant dense<0.000000e+00> : vector<2x16xf32>
    %295 = vector.multi_reduction <add>, %294, %cst_221 [2] : vector<2x16x32xf32> to vector<2x16xf32>
    %296 = vector.shape_cast %295 : vector<2x16xf32> to vector<2x16x1xf32>
    %297 = arith.addf %296, %287 : vector<2x16x1xf32>
    %298 = vector.broadcast %261 : vector<1x1x32xf32> to vector<2x16x32xf32>
    %299 = arith.mulf %273, %298 : vector<2x16x32xf32>
    %cst_222 = arith.constant dense<0.000000e+00> : vector<2x16xf32>
    %300 = vector.multi_reduction <add>, %299, %cst_222 [2] : vector<2x16x32xf32> to vector<2x16xf32>
    %301 = vector.shape_cast %300 : vector<2x16xf32> to vector<2x16x1xf32>
    %302 = arith.addf %301, %287 : vector<2x16x1xf32>
    %303 = arith.maximumf %292, %297 : vector<2x16x1xf32>
    %304 = arith.maximumf %303, %302 : vector<2x16x1xf32>
    %305 = arith.subf %292, %304 : vector<2x16x1xf32>
    %306 = math.exp %305 : vector<2x16x1xf32>
    %307 = arith.subf %297, %304 : vector<2x16x1xf32>
    %308 = math.exp %307 : vector<2x16x1xf32>
    %309 = arith.subf %302, %304 : vector<2x16x1xf32>
    %310 = math.exp %309 : vector<2x16x1xf32>
    %311 = arith.addf %306, %308 : vector<2x16x1xf32>
    %312 = arith.addf %311, %310 : vector<2x16x1xf32>
    %cst_223 = arith.constant 1.000000e+00 : f32
    %313 = vector.broadcast %cst_223 : f32 to vector<2x16x1xf32>
    %314 = arith.divf %313, %312 : vector<2x16x1xf32>
    %315 = arith.mulf %306, %314 : vector<2x16x1xf32>
    %316 = vector.broadcast %315 : vector<2x16x1xf32> to vector<2x16x32xf32>
    %317 = arith.mulf %316, %265 : vector<2x16x32xf32>
    %318 = arith.mulf %308, %314 : vector<2x16x1xf32>
    %319 = vector.broadcast %318 : vector<2x16x1xf32> to vector<2x16x32xf32>
    %320 = arith.mulf %319, %269 : vector<2x16x32xf32>
    %321 = arith.addf %317, %320 : vector<2x16x32xf32>
    %322 = arith.mulf %310, %314 : vector<2x16x1xf32>
    %323 = vector.broadcast %322 : vector<2x16x1xf32> to vector<2x16x32xf32>
    %324 = arith.mulf %323, %273 : vector<2x16x32xf32>
    %325 = arith.addf %321, %324 : vector<2x16x32xf32>
    %326 = vector.shape_cast %71 : vector<32x32xf32> to vector<2x16x32xf32>
    %cst_224 = arith.constant 1.000000e+00 : f32
    %327 = vector.broadcast %cst_224 : f32 to vector<2x16x32xf32>
    %328 = arith.subf %327, %326 : vector<2x16x32xf32>
    %329 = arith.mulf %328, %260 : vector<2x16x32xf32>
    %330 = arith.mulf %326, %325 : vector<2x16x32xf32>
    %331 = arith.addf %329, %330 : vector<2x16x32xf32>
    %c0_225 = arith.constant 0 : index
    %c0_226 = arith.constant 0 : index
    %c0_227 = arith.constant 0 : index
    %332 = vector.load %arg17[%c0_225, %c0_226, %c0_227] : memref<2x16x32xf32, #tpu.memory_space<vmem>>, vector<2x16x32xf32>
    tpu.vector_store %arg17[%c0_225, %c0_226, %c0_227], %331 {strides = array<i32>} : memref<2x16x32xf32, #tpu.memory_space<vmem>>, vector<2x16x32xf32>,
    %c0_228 = arith.constant 0 : index
    %c0_229 = arith.constant 0 : index
    %c0_230 = arith.constant 0 : index
    %c0_231 = arith.constant 0 : index
    %333 = vector.load %arg18[%c0_228, %c0_229, %c0_230, %c0_231] : memref<3x2x16x32xf32, #tpu.memory_space<vmem>>, vector<1x2x16x32xf32>
    %334 = vector.shape_cast %333 : vector<1x2x16x32xf32> to vector<2x16x32xf32>
    %335 = vector.shape_cast %4 : vector<2x16x32xf32> to vector<1x2x16x32xf32>
    tpu.vector_store %arg18[%c0_228, %c0_229, %c0_230, %c0_231], %335 {strides = array<i32>} : memref<3x2x16x32xf32, #tpu.memory_space<vmem>>, vector<1x2x16x32xf32>,
    %c1_232 = arith.constant 1 : index
    %c0_233 = arith.constant 0 : index
    %c0_234 = arith.constant 0 : index
    %c0_235 = arith.constant 0 : index
    %336 = vector.load %arg18[%c1_232, %c0_233, %c0_234, %c0_235] : memref<3x2x16x32xf32, #tpu.memory_space<vmem>>, vector<1x2x16x32xf32>
    %337 = vector.shape_cast %336 : vector<1x2x16x32xf32> to vector<2x16x32xf32>
    %338 = vector.shape_cast %6 : vector<2x16x32xf32> to vector<1x2x16x32xf32>
    tpu.vector_store %arg18[%c1_232, %c0_233, %c0_234, %c0_235], %338 {strides = array<i32>} : memref<3x2x16x32xf32, #tpu.memory_space<vmem>>, vector<1x2x16x32xf32>,
    %c2_236 = arith.constant 2 : index
    %c0_237 = arith.constant 0 : index
    %c0_238 = arith.constant 0 : index
    %c0_239 = arith.constant 0 : index
    %339 = vector.load %arg18[%c2_236, %c0_237, %c0_238, %c0_239] : memref<3x2x16x32xf32, #tpu.memory_space<vmem>>, vector<1x2x16x32xf32>
    %340 = vector.shape_cast %339 : vector<1x2x16x32xf32> to vector<2x16x32xf32>
    %341 = vector.shape_cast %331 : vector<2x16x32xf32> to vector<1x2x16x32xf32>
    tpu.vector_store %arg18[%c2_236, %c0_237, %c0_238, %c0_239], %341 {strides = array<i32>} : memref<3x2x16x32xf32, #tpu.memory_space<vmem>>, vector<1x2x16x32xf32>,
    return
  }
}

</mosaic_0001>

<bundles_post_ra>
// kernel: tsrn_cell_forward.1
= control target key start
LH: loop header
LB: loop body
LE: loop exit
PB: predicated region body
PF: predicated region fallthrough
CT: control target
= control target key end

     0   :  { %s6867_s0 = inlined_call_operand.vmem [shape: f32[32,32], index: 0, kind: input, shape index: {}]   ;;  %s6868_s1 = inlined_call_operand.vmem [shape: f32[3,2,16,32], index: 1, kind: input, shape index: {}, may-alias: {1,18}]   ;;  %s6869_s2 = inlined_call_operand.hbm [shape: bf16[3,3,32,32], index: 2, kind: input, shape index: {}]   ;;  %s6870_s3 = inlined_call_operand.vmem [shape: f32[3,1,32], index: 3, kind: input, shape index: {}]   ;;  %s6871_s4 = inlined_call_operand.hbm [shape: f32[16,16], index: 4, kind: input, shape index: {}]   ;;  %s6872_s5 = inlined_call_operand.hbm [shape: f32[16,16], index: 5, kind: input, shape index: {}]   ;;  %s6873_s6 = inlined_call_operand.hbm [shape: bf16[3,3,16,16], index: 6, kind: input, shape index: {}]   ;;  %s6874_s7 = inlined_call_operand.hbm [shape: bf16[3,3,16,16], index: 7, kind: input, shape index: {}]   ;;  %s6875_s8 = inlined_call_operand.hbm [shape: f32[1,16,16], index: 8, kind: input, shape index: {}]   ;;  %s6876_s9 = inlined_call_operand.hbm [shape: f32[1,16,16], index: 9, kind: input, shape index: {}]   ;;  %s6877_s10 = inlined_call_operand.hbm [shape: bf16[32,32], index: 10, kind: input, shape index: {}]   ;;  %s6878_s11 = inlined_call_operand.hbm [shape: f32[1,16,32], index: 11, kind: input, shape index: {}]   ;;  %s6879_s12 = inlined_call_operand.hbm [shape: f32[3,1,16,32], index: 12, kind: input, shape index: {}]   ;;  %s6880_s13 = inlined_call_operand.vmem [shape: f32[1,1,32], index: 13, kind: input, shape index: {}]   ;;  %s6881_s14 = inlined_call_operand.hbm [shape: f32[1,1,16], index: 14, kind: input, shape index: {}]   ;;  %s6882_s15 = inlined_call_operand.hbm [shape: f32[1,1,16], index: 15, kind: input, shape index: {}]   ;;  %s6883_s16 = inlined_call_operand.<no memory space> [shape: f32[1], index: 16, kind: input, shape index: {}]   ;;  %s6884_s17 = inlined_call_operand.vmem [shape: f32[2,16,32], index: 17, kind: output, shape index: {0}]   ;;  %s6885_s18 = inlined_call_operand.vmem [shape: f32[3,2,16,32], index: 18, kind: output, shape index: {1}, may-alias: {1,18}]  }
   0x1   :  { %6890 = sst [smem:[#allocation29_spill]] %s6867_s0 }
   0x2   :  { %6891 = sst [smem:[#allocation30_spill]] %s6868_s1 }
   0x3   :  { %6892 = sst [smem:[#allocation31_spill]] %s6869_s2 }
   0x4   :  { %6893 = sst [smem:[#allocation32_spill]] %s6884_s17 }
   0x5   :  { %25 = vsyncpa [#allocation4], 0 }
   0x6   :  { %26 = vsyncpa [#allocation6], 0 }
   0x7   :  { %27 = vsyncpa [#allocation9], 0 }
   0x8   :  { %28 = vsyncpa [#allocation12], 0 }
   0x9   :  { %29 = vsyncpa [#allocation15], 0 }
   0xa   :  { %30 = vsyncpa [#allocation18], 0 }
   0xb   :  { %31 = vsyncpa [#allocation21], 0  ;;  %s5946_s27 = smov [#allocation5]   ;;  %s5668_s0 = scalar_lea.hbm %s6871_s4, 256 }
   0xc   :  { %s55_s28 = sshll.u32 %s5946_s27, 4  ;;  %p5669_p0 = scmp.ne.s32.totalorder %s6871_s4, %s5668_s0  ;;  %s56_s28 = int_to_ptr.vmem [resolvable:$true] %s55_s28 }
   0xd   :  { %p5672_p1 = scmp.lt.u32.totalorder %s5668_s0, %s6871_s4 }
   0xf   :  { %p5674_p2 = pnand %p5672_p1, %p5669_p0 }
  0x11   :  { %5677 = shalt.err (!%p5674_p2)
}
  0x12   :  { %s5678_s22 = scalar_lea.vmem %s56_s28, 256  ;;  %p5683_p4 = scmp.lt.s32.totalorder %s56_s28, %s56_s28 }
  0x13   :  { %p5679_p3 = scmp.ne.s32.totalorder %s56_s28, %s5678_s22  ;;  %p5684_p5 = scmp.lt.s32.totalorder %s5678_s22, %s5678_s22 }
  0x15   :  { %p5685_p6 = por %p5684_p5, %p5683_p4 }
  0x17   :  { %p5686_p7 = pnand %p5685_p6, %p5679_p3 }
  0x19   :  { %5689 = shalt.err (!%p5686_p7)
}
  0x1a   :  { %s5947_s2 = smov 128   ;;  %s5948_s23 = smov 8  }
  0x1b   :  { %61 = dma.hbm_to_vmem [thread:$0]  %s6871_s4, 256, %s56_s28, [#allocation6], %s5947_s2, %s5947_s2, %s5948_s23  }
  0x1c   :  { %s5949_s26 = smov [#allocation8]   ;;  %s5950_s29 = smov [#allocation11]  }
  0x1d   :  { %s79_s27 = sshll.u32 %s5949_s26, 4  ;;  %s103_s30 = sshll.u32 %s5950_s29, 4  ;;  %s80_s27 = int_to_ptr.vmem [resolvable:$true] %s79_s27  ;;  %s104_s30 = int_to_ptr.vmem [resolvable:$true] %s103_s30 }
  0x1e   :  { %s5690_s1 = scalar_lea.hbm %s6873_s6, 1152 }
  0x1f   :  { %p5691_p8 = scmp.ne.s32.totalorder %s6873_s6, %s5690_s1  ;;  %p5694_p9 = scmp.lt.u32.totalorder %s5690_s1, %s6873_s6 }
  0x21   :  { %p5696_p10 = pnand %p5694_p9, %p5691_p8 }
  0x23   :  { %5699 = shalt.err (!%p5696_p10)
}
  0x24   :  { %s5700_s4 = scalar_lea.vmem %s80_s27, 1152  ;;  %p5705_p12 = scmp.lt.s32.totalorder %s80_s27, %s80_s27 }
  0x25   :  { %p5701_p11 = scmp.ne.s32.totalorder %s80_s27, %s5700_s4  ;;  %p5706_p13 = scmp.lt.s32.totalorder %s5700_s4, %s5700_s4 }
  0x27   :  { %p5707_p0 = por %p5706_p13, %p5705_p12 }
  0x29   :  { %p5708_p1 = pnand %p5707_p0, %p5701_p11 }
  0x2b   :  { %5711 = shalt.err (!%p5708_p1)
}
  0x2c   :  { %s5951_s28 = smov 64   ;;  %s5952_s24 = smov 4  }
  0x2d   :  { %85 = dma.hbm_to_vmem [thread:$0]  %s6873_s6, 1152, %s80_s27, [#allocation9], %s5951_s28, %s5951_s28, %s5952_s24  }
  0x2e   :  { %s5712_s0 = scalar_lea.hbm %s6875_s8, 256 }
  0x2f   :  { %p5713_p2 = scmp.ne.s32.totalorder %s6875_s8, %s5712_s0  ;;  %p5716_p3 = scmp.lt.u32.totalorder %s5712_s0, %s6875_s8 }
  0x31   :  { %p5718_p4 = pnand %p5716_p3, %p5713_p2 }
  0x33   :  { %5721 = shalt.err (!%p5718_p4)
}
  0x34   :  { %s5722_s22 = scalar_lea.vmem %s104_s30, 256  ;;  %p5727_p6 = scmp.lt.s32.totalorder %s104_s30, %s104_s30 }
  0x35   :  { %p5723_p5 = scmp.ne.s32.totalorder %s104_s30, %s5722_s22  ;;  %p5728_p7 = scmp.lt.s32.totalorder %s5722_s22, %s5722_s22 }
  0x37   :  { %p5729_p8 = por %p5728_p7, %p5727_p6 }
  0x39   :  { %p5730_p9 = pnand %p5729_p8, %p5723_p5 }
  0x3b   :  { %5733 = shalt.err (!%p5730_p9)
}
  0x3c   :  { %109 = dma.hbm_to_vmem [thread:$0]  %s6875_s8, 256, %s104_s30, [#allocation12], %s5947_s2, %s5947_s2, %s5948_s23  }
  0x3d   :  { %s5953_s4 = smov [#allocation14]   ;;  %s5954_s26 = smov [#allocation17]  }
  0x3e   :  { %s127_s25 = sshll.u32 %s5953_s4, 4  ;;  %s151_s17 = sshll.u32 %s5954_s26, 4  ;;  %s128_s25 = int_to_ptr.vmem [resolvable:$true] %s127_s25  ;;  %s152_s17 = int_to_ptr.vmem [resolvable:$true] %s151_s17 }
  0x3f   :  { %s5734_s19 = scalar_lea.hbm %s6877_s10, 256 }
  0x40   :  { %p5735_p10 = scmp.ne.s32.totalorder %s6877_s10, %s5734_s19  ;;  %p5738_p11 = scmp.lt.u32.totalorder %s5734_s19, %s6877_s10 }
  0x42   :  { %p5740_p12 = pnand %p5738_p11, %p5735_p10 }
  0x44   :  { %5743 = shalt.err (!%p5740_p12)
}
  0x45   :  { %s5744_s8 = scalar_lea.vmem %s128_s25, 256  ;;  %p5749_p0 = scmp.lt.s32.totalorder %s128_s25, %s128_s25 }
  0x46   :  { %p5745_p13 = scmp.ne.s32.totalorder %s128_s25, %s5744_s8  ;;  %p5750_p1 = scmp.lt.s32.totalorder %s5744_s8, %s5744_s8 }
  0x48   :  { %p5751_p2 = por %p5750_p1, %p5749_p0 }
  0x4a   :  { %p5752_p3 = pnand %p5751_p2, %p5745_p13 }
  0x4c   :  { %5755 = shalt.err (!%p5752_p3)
}
  0x4d   :  { %133 = dma.hbm_to_vmem [thread:$0]  %s6877_s10, 256, %s128_s25, [#allocation15], %s5951_s28, %s5951_s28, %s5952_s24  }
  0x4e   :  { %s5756_s26 = scalar_lea.hbm %s6879_s12, 768 }
  0x4f   :  { %p5757_p4 = scmp.ne.s32.totalorder %s6879_s12, %s5756_s26  ;;  %p5760_p5 = scmp.lt.u32.totalorder %s5756_s26, %s6879_s12 }
  0x51   :  { %p5762_p6 = pnand %p5760_p5, %p5757_p4 }
  0x53   :  { %5765 = shalt.err (!%p5762_p6)
}
  0x54   :  { %s5766_s20 = scalar_lea.vmem %s152_s17, 768  ;;  %p5771_p8 = scmp.lt.s32.totalorder %s152_s17, %s152_s17 }
  0x55   :  { %p5767_p7 = scmp.ne.s32.totalorder %s152_s17, %s5766_s20  ;;  %p5772_p9 = scmp.lt.s32.totalorder %s5766_s20, %s5766_s20 }
  0x57   :  { %p5773_p10 = por %p5772_p9, %p5771_p8 }
  0x59   :  { %p5774_p11 = pnand %p5773_p10, %p5767_p7 }
  0x5b   :  { %5777 = shalt.err (!%p5774_p11)
}
  0x5c   :  { %157 = dma.hbm_to_vmem [thread:$0]  %s6879_s12, 768, %s152_s17, [#allocation18], %s5947_s2, %s5947_s2, %s5948_s23  }
  0x5d   :  { %s5955_s21 = smov [#allocation3]   ;;  %s5956_s8 = smov [#allocation7]  }
  0x5e   :  { %s41_s22 = sshll.u32 %s5955_s21, 4  ;;  %s67_s30 = sshll.u32 %s5956_s8, 4  ;;  %s42_s22 = int_to_ptr.vmem [resolvable:$true] %s41_s22  ;;  %s68_s30 = int_to_ptr.vmem [resolvable:$true] %s67_s30 }
  0x5f   :  { %s6894_s4 = sld [smem:[#allocation31_spill]] }
  0x65   :  { %s5778_s26 = scalar_lea.hbm %s6894_s4, 2304 }
  0x66   :  { %p5779_p12 = scmp.ne.s32.totalorder %s6894_s4, %s5778_s26  ;;  %p5782_p13 = scmp.lt.u32.totalorder %s5778_s26, %s6894_s4 }
  0x68   :  { %p5784_p0 = pnand %p5782_p13, %p5779_p12 }
  0x6a   :  { %5787 = shalt.err (!%p5784_p0)
}
  0x6b   :  { %s5788_s12 = scalar_lea.vmem %s42_s22, 2304  ;;  %p5793_p2 = scmp.lt.s32.totalorder %s42_s22, %s42_s22 }
  0x6c   :  { %p5789_p1 = scmp.ne.s32.totalorder %s42_s22, %s5788_s12  ;;  %p5794_p3 = scmp.lt.s32.totalorder %s5788_s12, %s5788_s12 }
  0x6e   :  { %p5795_p4 = por %p5794_p3, %p5793_p2 }
  0x70   :  { %p5796_p5 = pnand %p5795_p4, %p5789_p1 }
  0x72   :  { %5799 = shalt.err (!%p5796_p5)
}
  0x73   :  { %47 = dma.hbm_to_vmem [thread:$0]  %s6894_s4, 2304, %s42_s22, [#allocation4], %s5951_s28, %s5951_s28, %s5952_s24  }
  0x74   :  { %s5800_s21 = scalar_lea.hbm %s6872_s5, 256 }
  0x75   :  { %p5801_p6 = scmp.ne.s32.totalorder %s6872_s5, %s5800_s21  ;;  %p5804_p7 = scmp.lt.u32.totalorder %s5800_s21, %s6872_s5 }
  0x77   :  { %p5806_p8 = pnand %p5804_p7, %p5801_p6 }
  0x79   :  { %5809 = shalt.err (!%p5806_p8)
}
  0x7a   :  { %s5810_s29 = scalar_lea.vmem %s68_s30, 256  ;;  %p5815_p10 = scmp.lt.s32.totalorder %s68_s30, %s68_s30 }
  0x7b   :  { %p5811_p9 = scmp.ne.s32.totalorder %s68_s30, %s5810_s29  ;;  %p5816_p11 = scmp.lt.s32.totalorder %s5810_s29, %s5810_s29 }
  0x7d   :  { %p5817_p12 = por %p5816_p11, %p5815_p10 }
  0x7f   :  { %p5818_p13 = pnand %p5817_p12, %p5811_p9 }
  0x81   :  { %5821 = shalt.err (!%p5818_p13)
}
  0x82   :  { %73 = dma.hbm_to_vmem [thread:$0]  %s6872_s5, 256, %s68_s30, [#allocation6], %s5947_s2, %s5947_s2, %s5948_s23  }
  0x83   :  { %s5957_s0 = smov [#allocation10]   ;;  %s5958_s1 = smov [#allocation13]  }
  0x84   :  { %s91_s19 = sshll.u32 %s5957_s0, 4  ;;  %s115_s12 = sshll.u32 %s5958_s1, 4  ;;  %s92_s19 = int_to_ptr.vmem [resolvable:$true] %s91_s19  ;;  %s116_s12 = int_to_ptr.vmem [resolvable:$true] %s115_s12 }
  0x85   :  { %s5822_s10 = scalar_lea.hbm %s6874_s7, 1152 }
  0x86   :  { %p5823_p0 = scmp.ne.s32.totalorder %s6874_s7, %s5822_s10  ;;  %p5826_p1 = scmp.lt.u32.totalorder %s5822_s10, %s6874_s7 }
  0x88   :  { %p5828_p2 = pnand %p5826_p1, %p5823_p0 }
  0x8a   :  { %5831 = shalt.err (!%p5828_p2)
}
  0x8b   :  { %s5832_s5 = scalar_lea.vmem %s92_s19, 1152  ;;  %p5837_p4 = scmp.lt.s32.totalorder %s92_s19, %s92_s19 }
  0x8c   :  { %p5833_p3 = scmp.ne.s32.totalorder %s92_s19, %s5832_s5  ;;  %p5838_p5 = scmp.lt.s32.totalorder %s5832_s5, %s5832_s5 }
  0x8e   :  { %p5839_p6 = por %p5838_p5, %p5837_p4 }
  0x90   :  { %p5840_p7 = pnand %p5839_p6, %p5833_p3 }
  0x92   :  { %5843 = shalt.err (!%p5840_p7)
}
  0x93   :  { %97 = dma.hbm_to_vmem [thread:$0]  %s6874_s7, 1152, %s92_s19, [#allocation9], %s5951_s28, %s5951_s28, %s5952_s24  }
  0x94   :  { %s5844_s22 = scalar_lea.hbm %s6876_s9, 256 }
  0x95   :  { %p5845_p8 = scmp.ne.s32.totalorder %s6876_s9, %s5844_s22  ;;  %p5848_p9 = scmp.lt.u32.totalorder %s5844_s22, %s6876_s9 }
  0x97   :  { %p5850_p10 = pnand %p5848_p9, %p5845_p8 }
  0x99   :  { %5853 = shalt.err (!%p5850_p10)
}
  0x9a   :  { %s5854_s20 = scalar_lea.vmem %s116_s12, 256  ;;  %p5859_p12 = scmp.lt.s32.totalorder %s116_s12, %s116_s12 }
  0x9b   :  { %p5855_p11 = scmp.ne.s32.totalorder %s116_s12, %s5854_s20  ;;  %p5860_p13 = scmp.lt.s32.totalorder %s5854_s20, %s5854_s20 }
  0x9d   :  { %p5861_p0 = por %p5860_p13, %p5859_p12 }
  0x9f   :  { %p5862_p1 = pnand %p5861_p0, %p5855_p11 }
  0xa1   :  { %5865 = shalt.err (!%p5862_p1)
}
  0xa2   :  { %121 = dma.hbm_to_vmem [thread:$0]  %s6876_s9, 256, %s116_s12, [#allocation12], %s5947_s2, %s5947_s2, %s5948_s23  }
  0xa3   :  { %s5959_s24 = smov [#allocation16]   ;;  %s5960_s10 = smov [#allocation19]  }
  0xa4   :  { %s139_s19 = sshll.u32 %s5959_s24, 4  ;;  %s166_s25 = sshll.u32 %s5960_s10, 4  ;;  %s140_s19 = int_to_ptr.vmem [resolvable:$true] %s139_s19  ;;  %s167_s25 = int_to_ptr.vmem [resolvable:$true] %s166_s25 }
  0xa5   :  { %s5866_s6 = scalar_lea.hbm %s6878_s11, 256 }
  0xa6   :  { %p5867_p2 = scmp.ne.s32.totalorder %s6878_s11, %s5866_s6  ;;  %p5870_p3 = scmp.lt.u32.totalorder %s5866_s6, %s6878_s11 }
  0xa8   :  { %p5872_p4 = pnand %p5870_p3, %p5867_p2 }
  0xaa   :  { %5875 = shalt.err (!%p5872_p4)
}
  0xab   :  { %s5876_s9 = scalar_lea.vmem %s140_s19, 256  ;;  %p5881_p6 = scmp.lt.s32.totalorder %s140_s19, %s140_s19 }
  0xac   :  { %p5877_p5 = scmp.ne.s32.totalorder %s140_s19, %s5876_s9  ;;  %p5882_p7 = scmp.lt.s32.totalorder %s5876_s9, %s5876_s9 }
  0xae   :  { %p5883_p8 = por %p5882_p7, %p5881_p6 }
  0xb0   :  { %p5884_p9 = pnand %p5883_p8, %p5877_p5 }
  0xb2   :  { %5887 = shalt.err (!%p5884_p9)
}
  0xb3   :  { %145 = dma.hbm_to_vmem [thread:$0]  %s6878_s11, 256, %s140_s19, [#allocation15], %s5947_s2, %s5947_s2, %s5948_s23  }
  0xb4   :  { %s5888_s0 = scalar_lea.hbm %s6881_s14, 16 }
  0xb5   :  { %p5889_p10 = scmp.ne.s32.totalorder %s6881_s14, %s5888_s0  ;;  %p5892_p11 = scmp.lt.u32.totalorder %s5888_s0, %s6881_s14 }
  0xb7   :  { %p5894_p12 = pnand %p5892_p11, %p5889_p10 }
  0xb9   :  { %5897 = shalt.err (!%p5894_p12)
}
  0xba   :  { %s5898_s28 = scalar_lea.vmem %s167_s25, 16  ;;  %s5902_s24 = scalar_lea.vmem %s167_s25, 32 }
  0xbb   :  { %p5899_p13 = scmp.ne.s32.totalorder %s167_s25, %s5898_s28  ;;  %p5903_p0 = scmp.lt.s32.totalorder %s167_s25, %s167_s25 }
  0xbc   :  { %p5904_p1 = scmp.lt.s32.totalorder %s5902_s24, %s5898_s28 }
  0xbe   :  { %p5905_p2 = por %p5904_p1, %p5903_p0 }
  0xc0   :  { %p5906_p3 = pnand %p5905_p2, %p5899_p13 }
  0xc2   :  { %5909 = shalt.err (!%p5906_p3)
}
  0xc3   :  { %169 = dma.hbm_to_vmem [thread:$0]  %s6881_s14, 16, %s167_s25, [#allocation18]  }
  0xc4   :  { %s5961_s23 = smov [#allocation20]   ;;  %s5910_s8 = scalar_lea.hbm %s6882_s15, 16 }
  0xc5   :  { %s176_s19 = sshll.u32 %s5961_s23, 4  ;;  %p5911_p4 = scmp.ne.s32.totalorder %s6882_s15, %s5910_s8  ;;  %s177_s19 = int_to_ptr.vmem [resolvable:$true] %s176_s19 }
  0xc6   :  { %p5914_p5 = scmp.lt.u32.totalorder %s5910_s8, %s6882_s15 }
  0xc8   :  { %p5916_p6 = pnand %p5914_p5, %p5911_p4 }
  0xca   :  { %5919 = shalt.err (!%p5916_p6)
}
  0xcb   :  { %s5920_s26 = scalar_lea.vmem %s177_s19, 16  ;;  %s5924_s14 = scalar_lea.vmem %s177_s19, 32 }
  0xcc   :  { %p5921_p7 = scmp.ne.s32.totalorder %s177_s19, %s5920_s26  ;;  %p5925_p8 = scmp.lt.s32.totalorder %s177_s19, %s177_s19 }
  0xcd   :  { %p5926_p9 = scmp.lt.s32.totalorder %s5924_s14, %s5920_s26 }
  0xcf   :  { %p5927_p10 = por %p5926_p9, %p5925_p8 }
  0xd1   :  { %p5928_p11 = pnand %p5927_p10, %p5921_p7 }
  0xd3   :  { %5931 = shalt.err (!%p5928_p11)
}
  0xd4   :  { %179 = dma.hbm_to_vmem [thread:$0]  %s6882_s15, 16, %s177_s19, [#allocation21]  }
  0xd5   :  { %5932 = dma.done.wait [#allocation4], 2304  }
  0xd6   :  { %5933 = vsyncadd [#allocation4], 4294964992 }
  0xd7   :  { %5934 = dma.done.wait [#allocation6], 512  }
  0xd8   :  { %5935 = vsyncadd [#allocation6], 4294966784 }
  0xd9   :  { %5936 = dma.done.wait [#allocation9], 2304  }
  0xda   :  { %5937 = vsyncadd [#allocation9], 4294964992 }
  0xdb   :  { %5938 = dma.done.wait [#allocation12], 512  }
  0xdc   :  { %5939 = vsyncadd [#allocation12], 4294966784 }
  0xdd   :  { %5940 = dma.done.wait [#allocation15], 512  }
  0xde   :  { %5941 = vsyncadd [#allocation15], 4294966784 }
  0xdf   :  { %5942 = dma.done.wait [#allocation18], 784  }
  0xe0   :  { %5943 = vsyncadd [#allocation18], 4294966512 }
  0xe1   :  { %5944 = dma.done.wait [#allocation21], 16  }
  0xe2   :  { %5945 = vsyncadd [#allocation21], 4294967280  ;;  %v5542_v0 = vld [vmem:[#allocation3 + $0x30] sm:$0xff]   ;;  %v5543_v1 = vld [vmem:[#allocation3 + $0x40] sm:$0xff]   ;;  %s6895_s29 = sld [smem:[#allocation30_spill]]  ;;  %vm264_vm0 = vcmask 261120  }
  0xe3   :  { %4977 = vmatprep.subr.bf16.mxu0 %v5542_v0  ;;  %v5544_v2 = vld [vmem:[#allocation3 + $0x38] sm:$0xff]   ;;  %5001 = vmatprep.subr.bf16.mxu1 %v5543_v1  ;;  %v5545_v3 = vld [vmem:[#allocation3 + $0x48] sm:$0xff]   ;;  %v5546_v10 = vld [vmem:[#allocation3] sm:$0xff]   ;;  %s6896_s24 = sld [smem:[#allocation29_spill]]  ;;  %vm988_vm1 = vcmask 130048   ;;  %s5962_s20 = smov 112  }
  0xe4   :  { %4978 = vmatpush3.bf16.msra.mxu0 %v5542_v0  ;;  %5002 = vmatpush3.bf16.msra.mxu1 %v5543_v1  ;;  %v5547_v11 = vld [vmem:[#allocation3 + $0x10] sm:$0xff]   ;;  %v5548_v12 = vld [vmem:[#allocation3 + $0x8] sm:$0xff]   ;;  %v5549_v13 = vld [vmem:[#allocation3 + $0x18] sm:$0xff]   ;;  %s6897_s17 = sld [smem:[#allocation32_spill]] }
  0xe5   :  { %4979 = vmatprep.subr.bf16.mxu0 %v5544_v2  ;;  %5003 = vmatprep.subr.bf16.mxu1 %v5545_v3  ;;  %v5550_v17 = vld [vmem:[#allocation3 + $0x60] sm:$0xff]   ;;  %v5551_v19 = vld [vmem:[#allocation3 + $0x70] sm:$0xff]   ;;  %v5552_v26 = vld [vmem:[#allocation3 + $0x68] sm:$0xff]  }
  0xe6   :  { %v5553_v27 = vld [vmem:[#allocation3 + $0x78] sm:$0xff]   ;;  %v5554_v29 = vld [vmem:[#allocation3 + $0x50] sm:$0xff]   ;;  %v5556_v33 = vld [vmem:[#allocation3 + $0x20] sm:$0xff]  }
  0xe7   :  { %v6351_v31 = vld [vmem:[#allocation5] sm:$0xff]  ;;  %v5555_v32 = vld [vmem:[#allocation3 + $0x58] sm:$0xff]   ;;  %v5557_v35 = vld [vmem:[#allocation3 + $0x28] sm:$0xff]  }
  0xe8   :  { %v6235_v4 = vld [vmem:[%s6895_s29 + $0x40] sm:$0xff]  ;;  %v6240_v5 = vld [vmem:[%s6895_s29 + $0x48] sm:$0xff]  ;;  %v6245_v6 = vld [vmem:[%s6895_s29 + $0x50] sm:$0xff]  ;;  %4980 = vmatpush3.bf16.msra.mxu0 %v5544_v2  ;;  %5004 = vmatpush3.bf16.msra.mxu1 %v5545_v3 }
  0xe9   :  { %v6249_v7 = vpack.c.bf16 %v6240_v5, %v6235_v4  ;;  %v6254_v8 = vld [vmem:[%s6895_s29 + $0x58] sm:$0xff]  ;;  %4985 = vmatprep.subr.bf16.mxu0 %v5546_v10  ;;  %5009 = vmatprep.subr.bf16.mxu1 %v5547_v11  ;;  %v6267_v14 = vld [vmem:[%s6896_s24] sm:$0xff]  ;;  %v6272_v15 = vld [vmem:[%s6896_s24 + $0x8] sm:$0xff] }
  0xea   :  { %v6258_v9 = vpack.c.bf16 %v6254_v8, %v6245_v6  ;;  %v6278_v16 = vpack.c.bf16 %v6272_v15, %v6267_v14  ;;  %v6287_v18 = vld [vmem:[%s6896_s24 + $0x10] sm:$0xff]  ;;  %v6294_v20 = vld [vmem:[%s6896_s24 + $0x18] sm:$0xff]  ;;  %v6299_v21 = vld [vmem:[%s6895_s29 + $0x20] sm:$0xff]  ;;  %2544 = vrot.lane.b32.xlu0 %v6267_v14, %s5962_s20 }
  0xeb   :  { %4981 = vmatprep.mubr.msk.bf16.mxu0 %vm264_vm0, %v6249_v7  ;;  %5005 = vmatprep.mubr.msk.bf16.mxu1 %vm264_vm0, %v6249_v7  ;;  %v6304_v22 = vld [vmem:[%s6895_s29 + $0x28] sm:$0xff]  ;;  %v6338_v25 = vpack.c.bf16 %v6294_v20, %v6287_v18  ;;  %v6361_v34 = vld [vmem:[#allocation5 + $0x8] sm:$0xff]  ;;  %v5558_v36 = vld [vmem:[#allocation3 + $0x80] sm:$0xff]  }
  0xec   :  { %4982 = vmatmul.mubr.msk.bf16.vlgmr.msra.gmra.mrb[0].mxu0 %vm264_vm0, %v6258_v9  ;;  %5006 = vmatmul.mubr.msk.bf16.vlgmr.msra.gmra.mrb[0].mxu1 %vm264_vm0, %v6258_v9  ;;  %4777 = vst.msk [vmem:[%s6885_s18 + $0x20] sm:$0xff] %vm264_vm0, %v6235_v4  ;;  %v241_v28 = vpack.c.bf16 %v6304_v22, %v6299_v21  ;;  %v5559_v37 = vld [vmem:[#allocation3 + $0x88] sm:$0xff]   ;;  %v5560_v38 = vld [vmem:[#allocation8 + $0x8] sm:$0xff]   ;;  %v5561_v39 = vld [vmem:[#allocation8] sm:$0xff]  }
  0xed   :  { %4986 = vmatpush3.bf16.msra.mxu0 %v5546_v10  ;;  %5010 = vmatpush3.bf16.msra.mxu1 %v5547_v11  ;;  %v4625_v40 = vld [vmem:[%s6870_s3] ss:$0 sm:$0xff]  ;;  %v4643_v42 = vld [vmem:[%s6870_s3 + $0x1] ss:$0 sm:$0xff] }
  0xee   :  { %4987 = vmatprep.subr.bf16.mxu0 %v5548_v12  ;;  %5011 = vmatprep.subr.bf16.mxu1 %v5549_v13 }
  0xef   :  { %4989 = vmatprep.mubr.msk.bf16.mxu0 %vm264_vm0, %v6278_v16  ;;  %5013 = vmatprep.mubr.msk.bf16.mxu1 %vm264_vm0, %v6278_v16 }
  0xf0   :  { %2633 = vrot.lane.b32.xlu1 %v6287_v18, %s5962_s20  ;;  %2546 = vrot.lane.b32.xlu0 %v6272_v15, %s5962_s20 }
  0xf1   :  { %4988 = vmatpush3.bf16.msra.mxu0 %v5548_v12  ;;  %5012 = vmatpush3.bf16.msra.mxu1 %v5549_v13 }
  0xf2   :  { %4993 = vmatprep.subr.bf16.mxu0 %v5550_v17  ;;  %5017 = vmatprep.subr.bf16.mxu1 %v5551_v19 }
  0xf3   :  { %v6314_v23 = vld [vmem:[%s6895_s29 + $0x30] sm:$0xff]  ;;  %v6319_v24 = vld [vmem:[%s6895_s29 + $0x38] sm:$0xff] }
  0xf4   :  { %4778 = vst.msk [vmem:[%s6885_s18 + $0x28] sm:$0xff] %vm264_vm0, %v6240_v5  ;;  %4779 = vst.msk [vmem:[%s6885_s18 + $0x30] sm:$0xff] %vm264_vm0, %v6245_v6  ;;  %v242_v30 = vpack.c.bf16 %v6319_v24, %v6314_v23  ;;  %2635 = vrot.lane.b32.xlu1 %v6294_v20, %s5962_s20 }
  0xf5   :  { %4780 = vst.msk [vmem:[%s6885_s18 + $0x38] sm:$0xff] %vm264_vm0, %v6254_v8 }
  0xf8   :  { %4990 = vmatmul.mubr.msk.bf16.vlgmr.msra.gmra.mrb[0].mxu0 %vm264_vm0, %v6338_v25  ;;  %5014 = vmatmul.mubr.msk.bf16.vlgmr.msra.gmra.mrb[0].mxu1 %vm264_vm0, %v6338_v25 }
  0xf9   :  { %4994 = vmatpush3.bf16.msra.mxu0 %v5550_v17  ;;  %5018 = vmatpush3.bf16.msra.mxu1 %v5551_v19 }
  0xfa   :  { %4995 = vmatprep.subr.bf16.mxu0 %v5552_v26  ;;  %5019 = vmatprep.subr.bf16.mxu1 %v5553_v27 }
  0xfb   :  { %4997 = vmatprep.mubr.msk.bf16.mxu0 %vm264_vm0, %v241_v28  ;;  %5021 = vmatprep.mubr.msk.bf16.mxu1 %vm264_vm0, %v241_v28 }
  0xfd   :  { %4996 = vmatpush3.bf16.msra.mxu0 %v5552_v26  ;;  %5020 = vmatpush3.bf16.msra.mxu1 %v5553_v27 }
  0xfe   :  { %5025 = vmatprep.subr.bf16.mxu0 %v5554_v29  ;;  %5338 = vmatprep.subr.bf16.mxu1 %v6278_v16 }
 0x104   :  { %4998 = vmatmul.mubr.msk.bf16.vlgmr.msra.gmra.mrb[0].mxu0 %vm264_vm0, %v242_v30  ;;  %5022 = vmatmul.mubr.msk.bf16.vlgmr.msra.gmra.mrb[0].mxu1 %vm264_vm0, %v242_v30 }
 0x105   :  { %5026 = vmatpush3.bf16.msra.mxu0 %v5554_v29  ;;  %5340 = vmatpush3.bf16.msra.mxu1 %v6278_v16 }
 0x106   :  { %5053 = vmatprep.mubr.msk.f32.mxu1 %vm988_vm1, %v6351_v31  ;;  %5342 = vmatprep.subr.bf16.mxu1 %v6338_v25 }
 0x107   :  { %5027 = vmatprep.subr.bf16.mxu0 %v5555_v32  ;;  %5029 = vmatprep.mubr.msk.bf16.mxu0 %vm264_vm0, %v6249_v7 }
 0x109   :  { %5028 = vmatpush3.bf16.msra.mxu0 %v5555_v32 }
 0x10a   :  { %5033 = vmatprep.subr.bf16.mxu0 %v5556_v33 }
 0x10c   :  { %5030 = vmatmul.mubr.msk.bf16.vlgmr.msra.gmra.mrb[4].mxu0 %vm264_vm0, %v6258_v9  ;;  %5054 = vmatmul.mubr.msk.f32.vlgmr.msra.gmra.mrb[4].mxu1 %vm988_vm1, %v6361_v34 }
 0x10d   :  { %5034 = vmatpush3.bf16.msra.mxu0 %v5556_v33  ;;  %5344 = vmatpush3.bf16.msra.mxu1 %v6338_v25 }
 0x10e   :  { %5060 = vmatprep.mubr.msk.f32.mxu1 %vm988_vm1, %v6351_v31  ;;  %5035 = vmatprep.subr.bf16.mxu0 %v5557_v35 }
 0x10f   :  { %5037 = vmatprep.mubr.msk.bf16.mxu0 %vm264_vm0, %v6278_v16  ;;  %5063 = vmatprep.subr.bf16.mxu1 %v5560_v38 }
 0x110   :  { %5061 = vmatmul.mubr.msk.f32.vlgmr.msra.gmra.mrb[6].mxu1 %vm988_vm1, %v6361_v34 }
 0x111   :  { %5036 = vmatpush3.bf16.msra.mxu0 %v5557_v35  ;;  %5064 = vmatpush3.bf16.msra.mxu1 %v5560_v38 }
 0x112   :  { %5041 = vmatprep.subr.bf16.mxu0 %v5558_v36  ;;  %5069 = vmatprep.subr.bf16.mxu1 %v5561_v39 }
 0x118   :  { %5038 = vmatmul.mubr.msk.bf16.vlgmr.msra.gmra.mrb[4].mxu0 %vm264_vm0, %v6338_v25 }
 0x119   :  { %5042 = vmatpush3.bf16.msra.mxu0 %v5558_v36  ;;  %5045 = vmatprep.mubr.msk.bf16.mxu0 %vm264_vm0, %v241_v28 }
 0x11a   :  { %5043 = vmatprep.subr.bf16.mxu0 %v5559_v37 }
 0x11d   :  { %5044 = vmatpush3.bf16.msra.mxu0 %v5559_v37 }
 0x124   :  { %5046 = vmatmul.mubr.msk.bf16.vlgmr.msra.gmra.mrb[4].mxu0 %vm264_vm0, %v242_v30 }
 0x125   :  { %5105 = vmatprep.mubr.msk.f32.mxu0 %vm988_vm1, %v6351_v31 }
 0x1d7   :  { %v4999_v41 = vpop.f32.mrb[0].mxu0  ;;  %v5023_v45 = vpop.f32.mrb[0].mxu1 }
 0x1d8   :  { %v472_v43 = vadd.f32 %v4999_v41, %v4625_v40  ;;  %v444_v44 = vpop.f32.mrb[1].mxu0  ;;  %v710_v48 = vadd.f32 %v5023_v45, %v4643_v42  ;;  %v681_v49 = vpop.f32.mrb[1].mxu1 }
 0x1d9   :  { %v470_v46 = vadd.f32 %v4625_v40, %v444_v44  ;;  %v5000_v47 = vpop.f32.mrb[2].mxu0  ;;  %v708_v53 = vadd.f32 %v4643_v42, %v681_v49  ;;  %v5024_v54 = vpop.f32.mrb[2].mxu1 }
 0x1da   :  { %v4628_v50 = vmul.f32 -1.442695, %v472_v43  ;;  %v473_v51 = vadd.f32 %v5000_v47, %v4625_v40  ;;  %v447_v52 = vpop.f32.mrb[3].mxu0  ;;  %v711_v57 = vadd.f32 %v5024_v54, %v4643_v42  ;;  %v684_v58 = vpop.f32.mrb[3].mxu1  ;;  %v4646_v60 = vmul.f32 -1.442695, %v710_v48 }
 0x1db   :  { %v4626_v55 = vmul.f32 -1.442695, %v470_v46  ;;  %v471_v56 = vadd.f32 %v4625_v40, %v447_v52  ;;  %v709_v61 = vadd.f32 %v4643_v42, %v684_v58  ;;  %v4644_v63 = vmul.f32 -1.442695, %v708_v53 }
 0x1dc   :  { %5580 = vpow2.f32 %v4628_v50  ;;  %v4629_v59 = vmul.f32 -1.442695, %v473_v51  ;;  %v4647_v0 = vmul.f32 -1.442695, %v711_v57 }
 0x1dd   :  { %5582 = vpow2.f32 %v4626_v55  ;;  %v4627_v62 = vmul.f32 -1.442695, %v471_v56  ;;  %v4645_v1 = vmul.f32 -1.442695, %v709_v61 }
 0x1de   :  { %5584 = vpow2.f32 %v4629_v59 }
 0x1df   :  { %5586 = vpow2.f32 %v4627_v62  ;;  %v5055_v2 = vpop.f32.mrb[4].mxu1  ;;  %v5562_v62 = vld [vmem:[#allocation8 + $0x10] sm:$0xff]  }
 0x1e0   :  { %5588 = vpow2.f32 %v4646_v60  ;;  %v1061_v3 = vpop.f32.mrb[5].mxu1 }
 0x1e1   :  { %5590 = vpow2.f32 %v4644_v63  ;;  %v1145_v7 = vpack.c.bf16 %v5055_v2, %v1061_v3  ;;  %v5563_v63 = vld [vmem:[#allocation8 + $0x18] sm:$0xff]  }
 0x1e2   :  { %5592 = vpow2.f32 %v4647_v0 }
 0x1e3   :  { %5594 = vpow2.f32 %v4645_v1  ;;  %v5062_v9 = vpop.f32.mrb[6].mxu1  ;;  %5065 = vmatprep.mubr.msk.bf16.mxu1 %vm988_vm1, %v1145_v7 }
 0x1e4   :  { %v1136_v10 = vpop.f32.mrb[7].mxu1 }
 0x1e5   :  { %v1146_v12 = vpack.c.bf16 %v5062_v9, %v1136_v10 }
 0x1e6   :  { %v5581_v11 = vpop.eup %5580 }
 0x1e7   :  { %v5583_v13 = vpop.eup %5582  ;;  %v488_v17 = vadd.f32 1.0, %v5581_v11  ;;  %5066 = vmatmul.mubr.msk.bf16.vlgmr.msra.gmra.mrb[8].mxu1 %vm988_vm1, %v1146_v12 }
 0x1e8   :  { %v5585_v19 = vpop.eup %5584  ;;  %v486_v26 = vadd.f32 1.0, %v5583_v13  ;;  %5070 = vmatpush3.bf16.msra.mxu1 %v5561_v39  ;;  %5071 = vmatprep.mubr.msk.bf16.mxu1 %vm988_vm1, %v6278_v16 }
 0x1e9   :  { %v5587_v27 = vpop.eup %5586  ;;  %5596 = vrcp.f32 %v488_v17  ;;  %v489_v28 = vadd.f32 1.0, %v5585_v19  ;;  %5346 = vmatprep.subr.bf16.mxu1 %v1145_v7 }
 0x1ea   :  { %v5589_v29 = vpop.eup %5588  ;;  %5598 = vrcp.f32 %v486_v26  ;;  %v487_v30 = vadd.f32 1.0, %v5587_v27 }
 0x1eb   :  { %v5591_v32 = vpop.eup %5590  ;;  %5600 = vrcp.f32 %v489_v28  ;;  %v726_v37 = vadd.f32 1.0, %v5589_v29 }
 0x1ec   :  { %v5593_v33 = vpop.eup %5592  ;;  %5602 = vrcp.f32 %v487_v30  ;;  %v724_v35 = vadd.f32 1.0, %v5591_v32 }
 0x1ed   :  { %v5595_v36 = vpop.eup %5594  ;;  %v727_v40 = vadd.f32 1.0, %v5593_v33 }
 0x1ee   :  { %5604 = vrcp.f32 %v724_v35  ;;  %v725_v38 = vadd.f32 1.0, %v5595_v36 }
 0x1f0   :  { %5606 = vrcp.f32 %v725_v38 }
 0x1f1   :  { %5608 = vrcp.f32 %v726_v37 }
 0x1f2   :  { %5610 = vrcp.f32 %v727_v40 }
 0x1f3   :  { %v5597_v39 = vpop.eup %5596  ;;  %5072 = vmatmul.mubr.msk.bf16.vlgmr.msra.gmra.mrb[8].mxu1 %vm988_vm1, %v6338_v25 }
 0x1f4   :  { %v5599_v41 = vpop.eup %5598  ;;  %5348 = vmatpush3.bf16.msra.mxu1 %v1145_v7  ;;  %5079 = vmatprep.mubr.msk.f32.mxu1 %vm988_vm1, %v6351_v31  ;;  %v6416_v48 = vmul.f32 %v5597_v39, %v6245_v6 }
 0x1f5   :  { %v5601_v42 = vpop.eup %5600  ;;  %v6401_v43 = vmul.f32 %v5599_v41, %v6235_v4  ;;  %5350 = vmatprep.subr.bf16.mxu1 %v1146_v12 }
 0x1f6   :  { %v5603_v44 = vpop.eup %5602  ;;  %v6411_v47 = vmul.f32 %v5601_v42, %v6254_v8 }
 0x1f7   :  { %3151 = vrot.lane.b32.xlu0 %v6401_v43, %s5962_s20  ;;  %v6408_v45 = vmul.f32 %v5603_v44, %v6240_v5 }
 0x1f8   :  { %v5605_v46 = vpop.eup %5604  ;;  %v6433_v53 = vpack.c.bf16 %v6411_v47, %v6416_v48 }
 0x1f9   :  { %3153 = vrot.lane.b32.xlu1 %v6408_v45, %s5962_s20  ;;  %v6420_v49 = vpack.c.bf16 %v6408_v45, %v6401_v43  ;;  %v6426_v51 = vmul.f32 %v5605_v46, %v6299_v21 }
 0x1fa   :  { %v5607_v50 = vpop.eup %5606 }
 0x1fb   :  { %3234 = vrot.lane.b32.xlu0 %v6416_v48, %s5962_s20  ;;  %5354 = vmatprep.subr.bf16.mxu0 %v6420_v49  ;;  %v5609_v52 = vpop.eup %5608  ;;  %v6438_v54 = vmul.f32 %v5607_v50, %v6304_v22 }
 0x1fc   :  { %5080 = vmatmul.mubr.msk.f32.vlgmr.msra.gmra.mrb[12].mxu1 %vm988_vm1, %v6361_v34  ;;  %5356 = vmatpush3.bf16.msra.mxu0 %v6420_v49  ;;  %v5611_v55 = vpop.eup %5610  ;;  %v6448_v56 = vmul.f32 %v5609_v52, %v6314_v23 }
 0x1fd   :  { %5352 = vmatpush3.bf16.msra.mxu1 %v1146_v12  ;;  %3236 = vrot.lane.b32.xlu1 %v6411_v47, %s5962_s20  ;;  %v6458_v57 = vmul.f32 %v5611_v55, %v6319_v24  ;;  %v6476_v58 = vpack.c.bf16 %v6438_v54, %v6426_v51  ;;  %v6533_v55 = vpop.permute.xlu0 %2544 }
 0x1fe   :  { %5358 = vmatprep.subr.bf16.mxu0 %v6433_v53  ;;  %5086 = vmatprep.mubr.msk.f32.mxu1 %vm988_vm1, %v6351_v31 }
 0x1ff   :  { %3689 = vrot.lane.b32.xlu0 %v6426_v51, %s5962_s20  ;;  %5106 = vmatmul.mubr.msk.f32.vlgmr.msra.gmra.mrb[8].mxu0 %vm988_vm1, %v6361_v34  ;;  %v6482_v59 = vpack.c.bf16 %v6458_v57, %v6448_v56 }
 0x200   :  { %5087 = vmatmul.mubr.msk.f32.vlgmr.msra.gmra.mrb[14].mxu1 %vm988_vm1, %v6361_v34  ;;  %5360 = vmatpush3.bf16.msra.mxu0 %v6433_v53 }
 0x201   :  { %3691 = vrot.lane.b32.xlu1 %v6438_v54, %s5962_s20  ;;  %5112 = vmatprep.mubr.msk.f32.mxu0 %vm988_vm1, %v6351_v31 }
 0x202   :  { %5089 = vmatprep.subr.bf16.mxu1 %v5562_v62 }
 0x203   :  { %3772 = vrot.lane.b32.xlu0 %v6448_v56, %s5962_s20  ;;  %5113 = vmatmul.mubr.msk.f32.vlgmr.msra.gmra.mrb[10].mxu0 %vm988_vm1, %v6361_v34 }
 0x204   :  { %5125 = vmatprep.mubr.msk.f32.mxu0 %vm988_vm1, %v6351_v31  ;;  %5090 = vmatpush3.bf16.msra.mxu1 %v5562_v62 }
 0x205   :  { %3774 = vrot.lane.b32.xlu1 %v6458_v57, %s5962_s20  ;;  %5095 = vmatprep.subr.bf16.mxu1 %v5563_v63 }
 0x207   :  { %2782 = vrot.lane.b32.xlu0 %v6278_v16, %s5962_s20  ;;  %v6488_v16 = vpop.f32.mrb[4].mxu0 }
 0x209   :  { %2784 = vrot.lane.b32.xlu1 %v6338_v25, %s5962_s20  ;;  %v6490_v25 = vpop.f32.mrb[5].mxu0 }
 0x20a   :  { %v6492_v60 = vpop.f32.mrb[6].mxu0 }
 0x20b   :  { %3080 = vrot.lane.b32.xlu0 %v6420_v49, %s5962_s20  ;;  %v6494_v61 = vpop.f32.mrb[7].mxu0 }
 0x20d   :  { %3082 = vrot.lane.b32.xlu1 %v6433_v53, %s5962_s20 }
 0x20f   :  { %3618 = vrot.lane.b32.xlu0 %v6476_v58, %s5962_s20 }
 0x211   :  { %3620 = vrot.lane.b32.xlu1 %v6482_v59, %s5962_s20 }
 0x2cf   :  { %v5081_v0 = vpop.f32.mrb[12].mxu1 }
 0x2d0   :  { %v1421_v1 = vmul.f32 2.0, %v5081_v0  ;;  %v1336_v2 = vpop.f32.mrb[13].mxu1 }
 0x2d1   :  { %v1420_v3 = vmul.f32 2.0, %v1336_v2  ;;  %v6540_v2 = vpop.permute.xlu0 %2546 }
 0x2d2   :  { %v1425_v7 = vsub.f32 %v1421_v1, %v6272_v15  ;;  %v5107_v9 = vpop.f32.mrb[8].mxu0  ;;  %v6536_v1 = vpop.permute.xlu1 %2633 }
 0x2d3   :  { %v1424_v10 = vsub.f32 %v1420_v3, %v6267_v14  ;;  %v5088_v11 = vpop.f32.mrb[14].mxu1  ;;  %v1634_v12 = vpop.f32.mrb[9].mxu0  ;;  %v5564_v14 = vld [vmem:[#allocation8 + $0x20] sm:$0xff]   ;;  %v5385_v3 = vpack.c.bf16 %v6540_v2, %v6533_v55 }
 0x2d4   :  { %v1423_v13 = vmul.f32 2.0, %v5088_v11  ;;  %v1411_v17 = vpop.f32.mrb[15].mxu1  ;;  %v1718_v19 = vpack.c.bf16 %v5107_v9, %v1634_v12  ;;  %v224_v11 = vld [vmem:[%s6895_s29 + $0x8] sm:$0xff]  ;;  %v6576_v12 = vld [vmem:[%s6880_s13] ss:$0 sm:$0xff] }
 0x2d5   :  { %v1428_v26 = vpack.c.bf16 %v1425_v7, %v1424_v10  ;;  %v1422_v27 = vmul.f32 2.0, %v1411_v17  ;;  %v6558_v10 = vld [vmem:[#allocation7 + $0x8] sm:$0xff]  ;;  %4577 = vst.msk [vmem:[%s6885_s18 + $0x8] sm:$0xff] %vm264_vm0, %v6304_v22 }
 0x2d6   :  { %v1427_v28 = vsub.f32 %v1423_v13, %v6294_v20  ;;  %v5114_v29 = vpop.f32.mrb[10].mxu0  ;;  %5362 = vmatprep.subr.bf16.mxu0 %v1718_v19  ;;  %v5566_v20 = vld [vmem:[#allocation8 + $0x30] sm:$0xff]   ;;  %v6550_v7 = vpop.permute.xlu1 %2635  ;;  %v4323_v13 = vld [vmem:[#allocation17 + $0x8] sm:$0xff] }
 0x2d7   :  { %v1426_v30 = vsub.f32 %v1422_v27, %v6287_v18  ;;  %v1709_v32 = vpop.f32.mrb[11].mxu0  ;;  %5364 = vmatpush3.bf16.msra.mxu0 %v1718_v19  ;;  %5091 = vmatprep.mubr.msk.bf16.mxu1 %vm988_vm1, %v1428_v26  ;;  %v5565_v18 = vld [vmem:[#allocation8 + $0x28] sm:$0xff]   ;;  %v5389_v9 = vpack.c.bf16 %v6550_v7, %v6536_v1  ;;  %v6578_v17 = vadd.f32 %v4323_v13, %v224_v11  ;;  %v4322_v26 = vld [vmem:[#allocation17] sm:$0xff] }
 0x2d8   :  { %v1719_v15 = vpack.c.bf16 %v5114_v29, %v1709_v32 }
 0x2d9   :  { %v1429_v33 = vpack.c.bf16 %v1427_v28, %v1426_v30  ;;  %v4405_v32 = vmul.f32 %v6576_v12, %v6578_v17 }
 0x2da   :  { %5126 = vmatmul.mubr.msk.f32.vlgmr.msra.gmra.mrb[12].mxu0 %vm988_vm1, %v6361_v34  ;;  %5366 = vmatprep.subr.bf16.mxu0 %v1719_v15 }
 0x2db   :  { %5092 = vmatmul.mubr.msk.bf16.vlgmr.msra.gmra.mrb[8].mxu1 %vm988_vm1, %v1429_v33  ;;  %5368 = vmatpush3.bf16.msra.mxu0 %v1719_v15 }
 0x2dc   :  { %5097 = vmatprep.mubr.msk.bf16.mxu1 %vm988_vm1, %v6420_v49  ;;  %5370 = vmatprep.subr.bf16.mxu0 %v6476_v58  ;;  %v226_v27 = vld [vmem:[%s6895_s29 + $0x18] sm:$0xff] }
 0x2dd   :  { %5132 = vmatprep.mubr.msk.f32.mxu0 %vm988_vm1, %v6351_v31  ;;  %5096 = vmatpush3.bf16.msra.mxu1 %v5563_v63  ;;  %v6598_v29 = vadd.f32 %v4323_v13, %v226_v27 }
 0x2de   :  { %5133 = vmatmul.mubr.msk.f32.vlgmr.msra.gmra.mrb[14].mxu0 %vm988_vm1, %v6361_v34  ;;  %5115 = vmatprep.subr.bf16.mxu1 %v5564_v14 }
 0x2df   :  { %5372 = vmatpush3.bf16.msra.mxu0 %v6476_v58  ;;  %5151 = vmatprep.mubr.msk.f32.mxu0 %vm988_vm1, %v6351_v31 }
 0x2e0   :  { %5374 = vmatprep.subr.bf16.mxu0 %v6482_v59 }
 0x2e2   :  { %5152 = vmatmul.mubr.msk.f32.vlgmr.msra.gmra.mrb[16].mxu0 %vm988_vm1, %v6361_v34 }
 0x2e3   :  { %5376 = vmatpush3.bf16.msra.mxu0 %v6482_v59  ;;  %5158 = vmatprep.mubr.msk.f32.mxu0 %vm988_vm1, %v6351_v31 }
 0x2e6   :  { %5159 = vmatmul.mubr.msk.f32.vlgmr.msra.gmra.mrb[18].mxu0 %vm988_vm1, %v6361_v34 }
 0x2e7   :  { %5098 = vmatmul.mubr.msk.bf16.vlgmr.msra.gmra.mrb[8].mxu1 %vm988_vm1, %v6433_v53  ;;  %5171 = vmatprep.mubr.msk.f32.mxu0 %vm988_vm1, %v6351_v31 }
 0x2e8   :  { %5117 = vmatprep.mubr.msk.bf16.mxu1 %vm988_vm1, %v1718_v19  ;;  %5116 = vmatpush3.bf16.msra.mxu1 %v5564_v14  ;;  %v223_v19 = vld [vmem:[%s6895_s29] sm:$0xff]  ;;  %v4407_v14 = vmul.f32 %v6576_v12, %v6598_v29 }
 0x2e9   :  { %5135 = vmatprep.subr.bf16.mxu1 %v5565_v18  ;;  %v6591_v28 = vadd.f32 %v4322_v26, %v223_v19  ;;  %4576 = vst.msk [vmem:[%s6885_s18] sm:$0xff] %vm264_vm0, %v6299_v21  ;;  %4579 = vst.msk [vmem:[%s6885_s18 + $0x18] sm:$0xff] %vm264_vm0, %v6319_v24 }
 0x2eb   :  { %v4404_v33 = vmul.f32 %v6576_v12, %v6591_v28 }
 0x2f0   :  { %v225_v30 = vld [vmem:[%s6895_s29 + $0x10] sm:$0xff] }
 0x2f1   :  { %4578 = vst.msk [vmem:[%s6885_s18 + $0x10] sm:$0xff] %vm264_vm0, %v6314_v23 }
 0x2f3   :  { %5118 = vmatmul.mubr.msk.bf16.vlgmr.msra.gmra.mrb[8].mxu1 %vm988_vm1, %v1719_v15  ;;  %v6610_v15 = vadd.f32 %v4322_v26, %v225_v30  ;;  %v4330_v30 = vld [vmem:[#allocation17 + $0x18] sm:$0xff] }
 0x2f4   :  { %5136 = vmatpush3.bf16.msra.mxu1 %v5565_v18  ;;  %v4411_v18 = vsel %vm264_vm0, %v4405_v32, 0.0  ;;  %v6676_v32 = vadd.f32 %v6304_v22, %v4330_v30 }
 0x2f5   :  { %5141 = vmatprep.subr.bf16.mxu1 %v5566_v20  ;;  %4412 = vadd.xlane.f32.xlu0 %v4411_v18 }
 0x3ad   :  { %v5127_v35 = vpop.f32.mrb[12].mxu0 }
 0x3ae   :  { %v1939_v36 = vmul.f32 2.0, %v5127_v35  ;;  %v1854_v37 = vpop.f32.mrb[13].mxu0  ;;  %v4408_v35 = vsel %vm264_vm0, %v4404_v33, 0.0  ;;  %v4425_v33 = vmul.f32 %v6576_v12, %v6676_v32 }
 0x3af   :  { %v1938_v38 = vmul.f32 2.0, %v1854_v37  ;;  %4409 = vadd.xlane.f32.xlu1 %v4408_v35  ;;  %v6685_v35 = vadd.f32 %v6319_v24, %v4330_v30 }
 0x3b0   :  { %v1943_v40 = vsub.f32 %v1939_v36, %v6408_v45  ;;  %v5567_v45 = vld [vmem:[#allocation8 + $0x38] sm:$0xff]   ;;  %v4417_v36 = vsel %vm264_vm0, %v4407_v14, 0.0  ;;  %v4329_v14 = vld [vmem:[#allocation17 + $0x10] sm:$0xff] }
 0x3b1   :  { %v1942_v39 = vsub.f32 %v1938_v38, %v6401_v43  ;;  %v5134_v41 = vpop.f32.mrb[14].mxu0  ;;  %4418 = vadd.xlane.f32.xlu0 %v4417_v36  ;;  %v6627_v38 = vpop.permute.xlu0 %3151  ;;  %v6681_v18 = vadd.f32 %v6299_v21, %v4329_v14  ;;  %v4427_v22 = vmul.f32 %v6576_v12, %v6685_v35 }
 0x3b2   :  { %v1941_v42 = vmul.f32 2.0, %v5134_v41  ;;  %v1929_v44 = vpop.f32.mrb[15].mxu0 }
 0x3b3   :  { %v1946_v46 = vpack.c.bf16 %v1943_v40, %v1942_v39  ;;  %v1940_v49 = vmul.f32 2.0, %v1929_v44  ;;  %v4424_v36 = vmul.f32 %v6576_v12, %v6681_v18  ;;  %v4437_v21 = vsel %vm264_vm0, %v4427_v22, 0.0 }
 0x3b4   :  { %v1945_v50 = vsub.f32 %v1941_v42, %v6411_v47 }
 0x3b5   :  { %v1944_v52 = vsub.f32 %v1940_v49, %v6416_v48  ;;  %5137 = vmatprep.mubr.msk.bf16.mxu1 %vm988_vm1, %v1946_v46  ;;  %v5153_v53 = vpop.f32.mrb[16].mxu0  ;;  %v6629_v40 = vpop.permute.xlu0 %3234 }
 0x3b6   :  { %v2152_v62 = vpop.f32.mrb[17].mxu0  ;;  %v6631_v46 = vpop.permute.xlu1 %3153 }
 0x3b7   :  { %v1947_v63 = vpack.c.bf16 %v1945_v50, %v1944_v52  ;;  %v2236_v0 = vpack.c.bf16 %v5153_v53, %v2152_v62  ;;  %v5401_v13 = vpack.c.bf16 %v6631_v46, %v6627_v38 }
 0x3b9   :  { %5138 = vmatmul.mubr.msk.bf16.vlgmr.msra.gmra.mrb[8].mxu1 %vm988_vm1, %v1947_v63  ;;  %v5160_v43 = vpop.f32.mrb[18].mxu0  ;;  %5378 = vmatprep.subr.bf16.mxu0 %v2236_v0  ;;  %v6635_v63 = vpop.permute.xlu0 %3689 }
 0x3ba   :  { %5143 = vmatprep.mubr.msk.bf16.mxu1 %vm988_vm1, %v6476_v58  ;;  %v2227_v47 = vpop.f32.mrb[19].mxu0  ;;  %5380 = vmatpush3.bf16.msra.mxu0 %v2236_v0  ;;  %v6548_v58 = vld [vmem:[#allocation7] sm:$0xff] }
 0x3bb   :  { %v2237_v48 = vpack.c.bf16 %v5160_v43, %v2227_v47  ;;  %5142 = vmatpush3.bf16.msra.mxu1 %v5566_v20  ;;  %v4406_v20 = vmul.f32 %v6576_v12, %v6610_v15 }
 0x3bc   :  { %5161 = vmatprep.subr.bf16.mxu1 %v5567_v45 }
 0x3bd   :  { %5172 = vmatmul.mubr.msk.f32.vlgmr.msra.gmra.mrb[20].mxu0 %vm988_vm1, %v6361_v34  ;;  %5382 = vmatprep.subr.bf16.mxu0 %v2237_v48  ;;  %v4414_v37 = vsel %vm264_vm0, %v4406_v20, 0.0  ;;  %v4431_v20 = vsel %vm264_vm0, %v4425_v33, 0.0 }
 0x3be   :  { %5384 = vmatpush3.bf16.msra.mxu0 %v2237_v48  ;;  %5178 = vmatprep.mubr.msk.f32.mxu0 %vm988_vm1, %v6351_v31  ;;  %v5568_v31 = vld [vmem:[#allocation8 + $0x40] sm:$0xff]  }
 0x3bf   :  { %5386 = vmatprep.subr.bf16.mxu0 %v5385_v3  ;;  %4415 = vadd.xlane.f32.xlu1 %v4414_v37  ;;  %v4428_v37 = vsel %vm264_vm0, %v4424_v36, 0.0 }
 0x3c0   :  { %4432 = vadd.xlane.f32.xlu0 %v4431_v20 }
 0x3c1   :  { %5179 = vmatmul.mubr.msk.f32.vlgmr.msra.gmra.mrb[22].mxu0 %vm988_vm1, %v6361_v34  ;;  %v5569_v34 = vld [vmem:[#allocation10 + $0x8] sm:$0xff]  }
 0x3c2   :  { %5388 = vmatpush3.bf16.msra.mxu0 %v5385_v3  ;;  %5191 = vmatprep.mubr.msk.f32.mxu0 %vm988_vm1, %v6548_v58  ;;  %v6640_v3 = vpop.permute.xlu1 %3236 }
 0x3c3   :  { %5390 = vmatprep.subr.bf16.mxu0 %v5389_v9  ;;  %v5405_v26 = vpack.c.bf16 %v6640_v3, %v6629_v40  ;;  %4429 = vadd.xlane.f32.xlu1 %v4428_v37 }
 0x3c4   :  { %4438 = vadd.xlane.f32.xlu0 %v4437_v21 }
 0x3c5   :  { %5144 = vmatmul.mubr.msk.bf16.vlgmr.msra.gmra.mrb[8].mxu1 %vm988_vm1, %v6482_v59  ;;  %5192 = vmatmul.mubr.msk.f32.vlgmr.msra.gmra.mrb[24].mxu0 %vm988_vm1, %v6558_v10  ;;  %v5570_v59 = vld [vmem:[#allocation10] sm:$0xff]  }
 0x3c6   :  { %5163 = vmatprep.mubr.msk.bf16.mxu1 %vm988_vm1, %v2236_v0  ;;  %5392 = vmatpush3.bf16.msra.mxu0 %v5389_v9 }
 0x3c7   :  { %5198 = vmatprep.mubr.msk.f32.mxu0 %vm988_vm1, %v6548_v58  ;;  %5162 = vmatpush3.bf16.msra.mxu1 %v5567_v45 }
 0x3c8   :  { %5181 = vmatprep.subr.bf16.mxu1 %v5568_v31  ;;  %5201 = vmatprep.subr.bf16.mxu0 %v5569_v34 }
 0x3c9   :  { %5199 = vmatmul.mubr.msk.f32.vlgmr.msra.gmra.mrb[26].mxu0 %vm988_vm1, %v6558_v10 }
 0x3ca   :  { %5202 = vmatpush3.bf16.msra.mxu0 %v5569_v34 }
 0x3cb   :  { %5207 = vmatprep.subr.bf16.mxu0 %v5570_v59 }
 0x3d1   :  { %5164 = vmatmul.mubr.msk.bf16.vlgmr.msra.gmra.mrb[8].mxu1 %vm988_vm1, %v2237_v48 }
 0x3d2   :  { %5182 = vmatpush3.bf16.msra.mxu1 %v5568_v31 }
 0x490   :  { %v5173_v39 = vpop.f32.mrb[20].mxu0 }
 0x491   :  { %v2457_v41 = vmul.f32 2.0, %v5173_v39  ;;  %v2372_v42 = vpop.f32.mrb[21].mxu0  ;;  %v6693_v39 = vadd.f32 %v6314_v23, %v4329_v14 }
 0x492   :  { %v2456_v44 = vmul.f32 2.0, %v2372_v42  ;;  %v5571_v42 = vld [vmem:[#allocation10 + $0x10] sm:$0xff]  }
 0x493   :  { %v2461_v49 = vsub.f32 %v2457_v41, %v6438_v54  ;;  %v4426_v24 = vmul.f32 %v6576_v12, %v6693_v39 }
 0x494   :  { %v2460_v50 = vsub.f32 %v2456_v44, %v6426_v51  ;;  %v5180_v52 = vpop.f32.mrb[22].mxu0  ;;  %v6642_v51 = vpop.permute.xlu0 %3772  ;;  %v6699_v44 = vld [vmem:[#allocation10 + $0x18] sm:$0xff]  }
 0x495   :  { %v2459_v53 = vmul.f32 2.0, %v5180_v52  ;;  %v2447_v62 = vpop.f32.mrb[23].mxu0  ;;  %v4434_v41 = vsel %vm264_vm0, %v4426_v24, 0.0 }
 0x496   :  { %v2464_v0 = vpack.c.bf16 %v2461_v49, %v2460_v50  ;;  %v2458_v45 = vmul.f32 2.0, %v2447_v62  ;;  %4435 = vadd.xlane.f32.xlu1 %v4434_v41  ;;  %v2534_v49 = vld [vmem:[#allocation11] sm:$0xff]  ;;  %v2535_v50 = vld [vmem:[#allocation11 + $0x8] sm:$0xff] }
 0x497   :  { %v2463_v43 = vsub.f32 %v2459_v53, %v6458_v57  ;;  %v6648_v57 = vpop.permute.xlu1 %3691 }
 0x498   :  { %v2462_v47 = vsub.f32 %v2458_v45, %v6448_v56  ;;  %5183 = vmatprep.mubr.msk.bf16.mxu1 %vm988_vm1, %v2464_v0  ;;  %v5193_v48 = vpop.f32.mrb[24].mxu0  ;;  %v2783_v19 = vpop.permute.xlu0 %2782 }
 0x499   :  { %v2622_v9 = vpop.f32.mrb[25].mxu0 }
 0x49a   :  { %v2465_v54 = vpack.c.bf16 %v2463_v43, %v2462_v47  ;;  %v2714_v31 = vpack.c.bf16 %v5193_v48, %v2622_v9  ;;  %v4774_v48 = vld [vmem:[#allocation19] ss:$0 sm:$0xff] }
 0x49b   :  { %v6658_v27 = vpop.permute.xlu1 %3774 }
 0x49c   :  { %5184 = vmatmul.mubr.msk.bf16.vlgmr.msra.gmra.mrb[8].mxu1 %vm988_vm1, %v2465_v54  ;;  %v5200_v34 = vpop.f32.mrb[26].mxu0  ;;  %5203 = vmatprep.mubr.msk.bf16.mxu0 %vm988_vm1, %v2714_v31 }
 0x49d   :  { %v2705_v11 = vpop.f32.mrb[27].mxu0  ;;  %5224 = vmatprep.mubr.msk.f32.mxu1 %vm988_vm1, %v6548_v58 }
 0x49e   :  { %v2715_v56 = vpack.c.bf16 %v5200_v34, %v2705_v11 }
 0x4a0   :  { %5204 = vmatmul.mubr.msk.bf16.vlgmr.msra.gmra.mrb[28].mxu0 %vm988_vm1, %v2715_v56  ;;  %5398 = vmatprep.subr.bf16.mxu1 %v2715_v56 }
 0x4a1   :  { %5208 = vmatpush3.bf16.msra.mxu0 %v5570_v59  ;;  %5400 = vmatpush3.bf16.msra.mxu1 %v2715_v56  ;;  %v2785_v59 = vpop.permute.xlu1 %2784 }
 0x4a2   :  { %5394 = vmatprep.subr.bf16.mxu0 %v2714_v31  ;;  %5402 = vmatprep.subr.bf16.mxu1 %v5401_v13 }
 0x4a3   :  { %5209 = vmatprep.mubr.msk.bf16.mxu0 %vm988_vm1, %v2783_v19 }
 0x4a4   :  { %5225 = vmatmul.mubr.msk.f32.vlgmr.msra.gmra.mrb[16].mxu1 %vm988_vm1, %v6558_v10 }
 0x4a5   :  { %5404 = vmatpush3.bf16.msra.mxu1 %v5401_v13  ;;  %5243 = vmatprep.mubr.msk.f32.mxu1 %vm988_vm1, %v6548_v58 }
 0x4a6   :  { %5406 = vmatprep.subr.bf16.mxu1 %v5405_v26 }
 0x4a8   :  { %5244 = vmatmul.mubr.msk.f32.vlgmr.msra.gmra.mrb[18].mxu1 %vm988_vm1, %v6558_v10 }
 0x4a9   :  { %5408 = vmatpush3.bf16.msra.mxu1 %v5405_v26  ;;  %5250 = vmatprep.mubr.msk.f32.mxu1 %vm988_vm1, %v6548_v58 }
 0x4ac   :  { %5210 = vmatmul.mubr.msk.bf16.vlgmr.msra.gmra.mrb[28].mxu0 %vm988_vm1, %v2785_v59  ;;  %5251 = vmatmul.mubr.msk.f32.vlgmr.msra.gmra.mrb[20].mxu1 %vm988_vm1, %v6558_v10 }
 0x4ad   :  { %5396 = vmatpush3.bf16.msra.mxu0 %v2714_v31  ;;  %5217 = vmatprep.mubr.msk.f32.mxu0 %vm988_vm1, %v6548_v58 }
 0x4ae   :  { %5263 = vmatprep.mubr.msk.f32.mxu1 %vm988_vm1, %v6548_v58  ;;  %5227 = vmatprep.subr.bf16.mxu0 %v5571_v42 }
 0x4b4   :  { %5218 = vmatmul.mubr.msk.f32.vlgmr.msra.gmra.mrb[32].mxu0 %vm988_vm1, %v6558_v10 }
 0x4b5   :  { %5228 = vmatpush3.bf16.msra.mxu0 %v5571_v42 }
 0x4b6   :  { %5233 = vmatprep.subr.bf16.mxu0 %v6699_v44 }
 0x56f   :  { %v5185_v23 = vpop.f32.mrb[8].mxu1 }
 0x570   :  { %v2538_v52 = vadd.f32 %v5185_v23, %v2534_v49  ;;  %v2515_v53 = vpop.f32.mrb[9].mxu1 }
 0x571   :  { %v2536_v62 = vadd.f32 %v2534_v49, %v2515_v53  ;;  %v5186_v0 = vpop.f32.mrb[10].mxu1 }
 0x572   :  { %vm4159_vm2 = vcmp.ge.f32.partialorder %v2538_v52, 0.0  ;;  %v4163_v45 = vmul.f32 0.01, %v2538_v52  ;;  %v2539_v43 = vadd.f32 %v5186_v0, %v2535_v50  ;;  %v2518_v47 = vpop.f32.mrb[11].mxu1 }
 0x573   :  { %vm4157_vm3 = vcmp.ge.f32.partialorder %v2536_v62, 0.0  ;;  %v4161_v9 = vmul.f32 0.01, %v2536_v62  ;;  %v2537_v54 = vadd.f32 %v2535_v50, %v2518_v47  ;;  %v5421_v47 = vpack.c.bf16 %v6658_v27, %v6642_v51 }
 0x574   :  { %vm4160_vm4 = vcmp.ge.f32.partialorder %v2539_v43, 0.0  ;;  %v4164_v31 = vmul.f32 0.01, %v2539_v43  ;;  %v6702_v34 = vsel %vm4159_vm2, %v2538_v52, %v4163_v45 }
 0x575   :  { %vm4158_vm5 = vcmp.ge.f32.partialorder %v2537_v54, 0.0  ;;  %v4162_v11 = vmul.f32 0.01, %v2537_v54  ;;  %v4351_v56 = vmul.f32 %v4774_v48, %v6702_v34  ;;  %v6705_v13 = vsel %vm4157_vm3, %v2536_v62, %v4161_v9 }
 0x576   :  { %v6707_v19 = vsel %vm4160_vm4, %v2539_v43, %v4164_v31  ;;  %v4349_v33 = vmul.f32 %v4774_v48, %v6705_v13 }
 0x577   :  { %v5226_v26 = vpop.f32.mrb[16].mxu1  ;;  %v4359_v59 = vsel %vm988_vm1, %v4351_v56, 0.0  ;;  %v6710_v30 = vsel %vm4158_vm5, %v2537_v54, %v4162_v11  ;;  %v4186_v14 = vpack.c.bf16 %v6707_v19, %v6702_v34  ;;  %v4352_v50 = vmul.f32 %v4774_v48, %v6707_v19 }
 0x578   :  { %v3000_v20 = vmul.f32 2.0, %v5226_v26  ;;  %4360 = vadd.xlane.f32.xlu0 %v4359_v59  ;;  %v2988_v36 = vpop.f32.mrb[17].mxu1  ;;  %v4350_v22 = vmul.f32 %v4774_v48, %v6710_v30  ;;  %v4185_v37 = vpack.c.bf16 %v6710_v30, %v6705_v13  ;;  %v4353_v23 = vsel %vm988_vm1, %v4349_v33, 0.0  ;;  %v5573_v59 = vld [vmem:[#allocation10 + $0x20] sm:$0xff]   ;;  %v3081_v33 = vpop.permute.xlu0 %3080 }
 0x579   :  { %v2999_v21 = vmul.f32 2.0, %v2988_v36  ;;  %v4362_v45 = vsel %vm988_vm1, %v4352_v50, 0.0  ;;  %v4393_v19 = vstv %s6883_s16 }
 0x57a   :  { %v3004_v24 = vsub.f32 %v3000_v20, %v6550_v7  ;;  %v4356_v41 = vsel %vm988_vm1, %v4350_v22, 0.0  ;;  %v5575_v20 = vld [vmem:[#allocation10 + $0x30] sm:$0xff]  }
 0x57b   :  { %v3003_v42 = vsub.f32 %v2999_v21, %v6536_v1  ;;  %v5245_v49 = vpop.f32.mrb[18].mxu1  ;;  %4357 = vadd.xlane.f32.xlu1 %v4356_v41  ;;  %v5417_v1 = vpack.c.bf16 %v6648_v57, %v6635_v63 }
 0x57c   :  { %4354 = vadd.xlane.f32.xlu0 %v4353_v23  ;;  %v3223_v52 = vpop.f32.mrb[19].mxu1 }
 0x57d   :  { %v3006_v53 = vpack.c.bf16 %v3004_v24, %v3003_v42  ;;  %v3315_v62 = vpack.c.bf16 %v5245_v49, %v3223_v52 }
 0x57f   :  { %v5252_v0 = vpop.f32.mrb[20].mxu1  ;;  %5410 = vmatprep.subr.bf16.mxu1 %v3315_v62 }
 0x580   :  { %4363 = vadd.xlane.f32.xlu0 %v4362_v45  ;;  %v3306_v7 = vpop.f32.mrb[21].mxu1  ;;  %5412 = vmatpush3.bf16.msra.mxu1 %v3315_v62 }
 0x581   :  { %v3316_v43 = vpack.c.bf16 %v5252_v0, %v3306_v7 }
 0x583   :  { %5264 = vmatmul.mubr.msk.f32.vlgmr.msra.gmra.mrb[22].mxu1 %vm988_vm1, %v6558_v10  ;;  %5414 = vmatprep.subr.bf16.mxu1 %v3316_v43 }
 0x584   :  { %5416 = vmatpush3.bf16.msra.mxu1 %v3316_v43  ;;  %5270 = vmatprep.mubr.msk.f32.mxu1 %vm988_vm1, %v6548_v58 }
 0x585   :  { %5418 = vmatprep.subr.bf16.mxu1 %v5417_v1 }
 0x587   :  { %v5219_v48 = vpop.f32.mrb[32].mxu0  ;;  %5271 = vmatmul.mubr.msk.f32.vlgmr.msra.gmra.mrb[24].mxu1 %vm988_vm1, %v6558_v10 }
 0x588   :  { %v2998_v9 = vmul.f32 2.0, %v5219_v48  ;;  %v2913_v54 = vpop.f32.mrb[33].mxu0  ;;  %5420 = vmatpush3.bf16.msra.mxu1 %v5417_v1  ;;  %5289 = vmatprep.mubr.msk.f32.mxu1 %vm988_vm1, %v6548_v58  ;;  %v5576_v1 = vld [vmem:[#allocation10 + $0x38] sm:$0xff]  }
 0x589   :  { %v2997_v31 = vmul.f32 2.0, %v2913_v54  ;;  %5422 = vmatprep.subr.bf16.mxu1 %v5421_v47 }
 0x58a   :  { %v3002_v11 = vsub.f32 %v2998_v9, %v6540_v2  ;;  %v5574_v2 = vld [vmem:[#allocation10 + $0x28] sm:$0xff]  }
 0x58b   :  { %v3001_v56 = vsub.f32 %v2997_v31, %v6533_v55  ;;  %5290 = vmatmul.mubr.msk.f32.vlgmr.msra.gmra.mrb[26].mxu1 %vm988_vm1, %v6558_v10  ;;  %v3083_v55 = vpop.permute.xlu1 %3082 }
 0x58c   :  { %5424 = vmatpush3.bf16.msra.mxu1 %v5421_v47  ;;  %5296 = vmatprep.mubr.msk.f32.mxu1 %vm988_vm1, %v6548_v58  ;;  %v3619_v47 = vpop.permute.xlu0 %3618 }
 0x58d   :  { %v3005_v26 = vpack.c.bf16 %v3002_v11, %v3001_v56 }
 0x58f   :  { %5229 = vmatprep.mubr.msk.bf16.mxu0 %vm988_vm1, %v3005_v26  ;;  %5297 = vmatmul.mubr.msk.f32.vlgmr.msra.gmra.mrb[28].mxu1 %vm988_vm1, %v6558_v10 }
 0x590   :  { %5230 = vmatmul.mubr.msk.bf16.vlgmr.msra.gmra.mrb[28].mxu0 %vm988_vm1, %v3006_v53  ;;  %5309 = vmatprep.mubr.msk.f32.mxu1 %vm988_vm1, %v6548_v58  ;;  %v4413_v30 = vpop.xlane.xlu0 %4412 }
 0x591   :  { %5235 = vmatprep.mubr.msk.bf16.mxu0 %vm988_vm1, %v3081_v33  ;;  %5234 = vmatpush3.bf16.msra.mxu0 %v6699_v44 }
 0x592   :  { %5253 = vmatprep.subr.bf16.mxu0 %v5573_v59 }
 0x59c   :  { %5236 = vmatmul.mubr.msk.bf16.vlgmr.msra.gmra.mrb[28].mxu0 %vm988_vm1, %v3083_v55 }
 0x59d   :  { %5255 = vmatprep.mubr.msk.bf16.mxu0 %vm988_vm1, %v3315_v62  ;;  %5254 = vmatpush3.bf16.msra.mxu0 %v5573_v59 }
 0x59e   :  { %5273 = vmatprep.subr.bf16.mxu0 %v5574_v2 }
 0x5a8   :  { %5256 = vmatmul.mubr.msk.bf16.vlgmr.msra.gmra.mrb[28].mxu0 %vm988_vm1, %v3316_v43 }
 0x5a9   :  { %5274 = vmatpush3.bf16.msra.mxu0 %v5574_v2 }
 0x5aa   :  { %5279 = vmatprep.subr.bf16.mxu0 %v5575_v20 }
 0x656   :  { %v5265_v36 = vpop.f32.mrb[22].mxu1 }
 0x657   :  { %v3536_v22 = vmul.f32 2.0, %v5265_v36  ;;  %v3451_v21 = vpop.f32.mrb[23].mxu1 }
 0x658   :  { %v3535_v24 = vmul.f32 2.0, %v3451_v21 }
 0x659   :  { %v3540_v44 = vsub.f32 %v3536_v22, %v6631_v46  ;;  %v5578_v22 = vld [vmem:[#allocation14 + $0x8] sm:$0xff]  }
 0x65a   :  { %v3539_v41 = vsub.f32 %v3535_v24, %v6627_v38  ;;  %v5272_v42 = vpop.f32.mrb[24].mxu1  ;;  %v4152_v24 = vld [vmem:[#allocation13 + $0x8] sm:$0xff] }
 0x65b   :  { %v3538_v49 = vmul.f32 2.0, %v5272_v42  ;;  %v3526_v23 = vpop.f32.mrb[25].mxu1 }
 0x65c   :  { %v3543_v50 = vpack.c.bf16 %v3540_v44, %v3539_v41  ;;  %v3537_v52 = vmul.f32 2.0, %v3526_v23 }
 0x65d   :  { %v3542_v53 = vsub.f32 %v3538_v49, %v6640_v3  ;;  %v5577_v3 = vld [vmem:[#allocation10 + $0x40] sm:$0xff]  }
 0x65e   :  { %v3541_v62 = vsub.f32 %v3537_v52, %v6629_v40  ;;  %5275 = vmatprep.mubr.msk.bf16.mxu0 %vm988_vm1, %v3543_v50  ;;  %v5291_v0 = vpop.f32.mrb[26].mxu1  ;;  %v3621_v40 = vpop.permute.xlu1 %3620  ;;  %v4775_v52 = vld [vmem:[#allocation20] ss:$0 sm:$0xff] }
 0x65f   :  { %v3761_v45 = vpop.f32.mrb[27].mxu1 }
 0x660   :  { %v3544_v7 = vpack.c.bf16 %v3542_v53, %v3541_v62  ;;  %v3853_v43 = vpack.c.bf16 %v5291_v0, %v3761_v45  ;;  %v4337_v0 = vld [vmem:[#allocation17 + $0x28] sm:$0xff] }
 0x662   :  { %5276 = vmatmul.mubr.msk.bf16.vlgmr.msra.gmra.mrb[28].mxu0 %vm988_vm1, %v3544_v7  ;;  %v5298_v38 = vpop.f32.mrb[28].mxu1  ;;  %5426 = vmatprep.subr.bf16.mxu1 %v3853_v43 }
 0x663   :  { %5281 = vmatprep.mubr.msk.bf16.mxu0 %vm988_vm1, %v3619_v47  ;;  %v3844_v46 = vpop.f32.mrb[29].mxu1  ;;  %5428 = vmatpush3.bf16.msra.mxu1 %v3853_v43 }
 0x664   :  { %v3854_v48 = vpack.c.bf16 %v5298_v38, %v3844_v46  ;;  %5280 = vmatpush3.bf16.msra.mxu0 %v5575_v20 }
 0x665   :  { %5299 = vmatprep.subr.bf16.mxu0 %v5576_v1 }
 0x666   :  { %5310 = vmatmul.mubr.msk.f32.vlgmr.msra.gmra.mrb[30].mxu1 %vm988_vm1, %v6558_v10  ;;  %5430 = vmatprep.subr.bf16.mxu1 %v3854_v48 }
 0x667   :  { %5432 = vmatpush3.bf16.msra.mxu1 %v3854_v48  ;;  %5316 = vmatprep.mubr.msk.f32.mxu1 %vm988_vm1, %v6548_v58 }
 0x668   :  { %5325 = vmatprep.subr.bf16.mxu1 %v5578_v22 }
 0x66a   :  { %5317 = vmatmul.mubr.msk.f32.vlgmr.msra.gmra.mrb[32].mxu1 %vm988_vm1, %v6558_v10 }
 0x66b   :  { %5326 = vmatpush3.bf16.msra.mxu1 %v5578_v22 }
 0x66e   :  { %5282 = vmatmul.mubr.msk.bf16.vlgmr.msra.gmra.mrb[28].mxu0 %vm988_vm1, %v3621_v40  ;;  %v6779_v40 = vadd.f32 %v6240_v5, %v4337_v0 }
 0x66f   :  { %5301 = vmatprep.mubr.msk.bf16.mxu0 %vm988_vm1, %v3853_v43  ;;  %5300 = vmatpush3.bf16.msra.mxu0 %v5576_v1 }
 0x670   :  { %5319 = vmatprep.subr.bf16.mxu0 %v5577_v3 }
 0x67a   :  { %5302 = vmatmul.mubr.msk.bf16.vlgmr.msra.gmra.mrb[28].mxu0 %vm988_vm1, %v3854_v48 }
 0x67b   :  { %5320 = vmatpush3.bf16.msra.mxu0 %v5577_v3 }
 0x739   :  { %v5311_v9 = vpop.f32.mrb[30].mxu1 }
 0x73a   :  { %v4074_v54 = vmul.f32 2.0, %v5311_v9  ;;  %v3989_v31 = vpop.f32.mrb[31].mxu1 }
 0x73b   :  { %v4073_v11 = vmul.f32 2.0, %v3989_v31 }
 0x73c   :  { %v4078_v58 = vsub.f32 %v4074_v54, %v6648_v57  ;;  %v5579_v57 = vld [vmem:[#allocation14] sm:$0xff]  }
 0x73d   :  { %v4077_v56 = vsub.f32 %v4073_v11, %v6635_v63  ;;  %v5318_v10 = vpop.f32.mrb[32].mxu1  ;;  %5331 = vmatprep.subr.bf16.mxu1 %v5579_v57  ;;  %v4151_v63 = vld [vmem:[#allocation13] sm:$0xff] }
 0x73e   :  { %v4076_v26 = vmul.f32 2.0, %v5318_v10  ;;  %v4064_v59 = vpop.f32.mrb[33].mxu1 }
 0x73f   :  { %v4081_v33 = vpack.c.bf16 %v4078_v58, %v4077_v56  ;;  %v4075_v55 = vmul.f32 2.0, %v4064_v59  ;;  %v6794_v59 = vadd.f32 %v6254_v8, %v4337_v0 }
 0x740   :  { %v4080_v2 = vsub.f32 %v4076_v26, %v6658_v27  ;;  %v4336_v27 = vld [vmem:[#allocation17 + $0x20] sm:$0xff]  ;;  %v4445_v26 = vmul.f32 %v6576_v12, %v6779_v40 }
 0x741   :  { %v4079_v20 = vsub.f32 %v4075_v55, %v6642_v51  ;;  %5321 = vmatprep.mubr.msk.bf16.mxu0 %vm988_vm1, %v4081_v33  ;;  %v6776_v43 = vadd.f32 %v6235_v4, %v4336_v27  ;;  %v6786_v10 = vadd.f32 %v6245_v6, %v4336_v27  ;;  %v4447_v8 = vmul.f32 %v6576_v12, %v6794_v59 }
 0x743   :  { %v4082_v36 = vpack.c.bf16 %v4080_v2, %v4079_v20  ;;  %v4444_v56 = vmul.f32 %v6576_v12, %v6776_v43  ;;  %v4446_v55 = vmul.f32 %v6576_v12, %v6786_v10  ;;  %v4451_v2 = vsel %vm264_vm0, %v4445_v26, 0.0 }
 0x744   :  { %v4457_v13 = vsel %vm264_vm0, %v4447_v8, 0.0 }
 0x745   :  { %5322 = vmatmul.mubr.msk.bf16.vlgmr.msra.gmra.mrb[28].mxu0 %vm988_vm1, %v4082_v36  ;;  %v4448_v33 = vsel %vm264_vm0, %v4444_v56, 0.0  ;;  %v4454_v20 = vsel %vm264_vm0, %v4446_v55, 0.0  ;;  %v4410_v36 = vpop.xlane.xlu1 %4409 }
 0x818   :  { %v5323_v21 = vpop.f32.mrb[28].mxu0 }
 0x819   :  { %v4155_v44 = vadd.f32 %v5323_v21, %v4151_v63  ;;  %v4132_v41 = vpop.f32.mrb[29].mxu0 }
 0x81a   :  { %v4153_v42 = vadd.f32 %v4151_v63, %v4132_v41  ;;  %v5324_v49 = vpop.f32.mrb[30].mxu0 }
 0x81b   :  { %vm4171_vm6 = vcmp.ge.f32.partialorder %v4155_v44, 0.0  ;;  %v4175_v51 = vmul.f32 0.01, %v4155_v44  ;;  %v4156_v23 = vadd.f32 %v5324_v49, %v4152_v24  ;;  %v4135_v50 = vpop.f32.mrb[31].mxu0 }
 0x81c   :  { %vm4169_vm7 = vcmp.ge.f32.partialorder %v4153_v42, 0.0  ;;  %v4173_v53 = vmul.f32 0.01, %v4153_v42  ;;  %v4154_v62 = vadd.f32 %v4152_v24, %v4135_v50 }
 0x81d   :  { %vm4172_vm8 = vcmp.ge.f32.partialorder %v4156_v23, 0.0  ;;  %v4176_v45 = vmul.f32 0.01, %v4156_v23  ;;  %v4179_v7 = vsel %vm4171_vm6, %v4155_v44, %v4175_v51 }
 0x81e   :  { %v4177_v1 = vsel %vm4169_vm7, %v4153_v42, %v4173_v53  ;;  %vm4170_vm9 = vcmp.ge.f32.partialorder %v4154_v62, 0.0  ;;  %v4174_v47 = vmul.f32 0.01, %v4154_v62  ;;  %v4374_v38 = vmul.f32 %v4775_v52, %v4179_v7 }
 0x81f   :  { %v4180_v46 = vsel %vm4172_vm8, %v4156_v23, %v4176_v45  ;;  %v4372_v48 = vmul.f32 %v4775_v52, %v4177_v1 }
 0x820   :  { %v4178_v3 = vsel %vm4170_vm9, %v4154_v62, %v4174_v47  ;;  %v4382_v9 = vsel %vm988_vm1, %v4374_v38, 0.0  ;;  %v4375_v54 = vmul.f32 %v4775_v52, %v4180_v46  ;;  %v4188_v31 = vpack.c.bf16 %v4180_v46, %v4179_v7 }
 0x821   :  { %v4187_v11 = vpack.c.bf16 %v4178_v3, %v4177_v1  ;;  %4383 = vadd.xlane.f32.xlu1 %v4382_v9  ;;  %v4373_v4 = vmul.f32 %v4775_v52, %v4178_v3  ;;  %v4376_v5 = vsel %vm988_vm1, %v4372_v48, 0.0 }
 0x822   :  { %v4385_v58 = vsel %vm988_vm1, %v4375_v54, 0.0 }
 0x823   :  { %4386 = vadd.xlane.f32.xlu0 %v4385_v58  ;;  %5327 = vmatprep.mubr.msk.bf16.mxu1 %vm988_vm1, %v4187_v11  ;;  %v4379_v6 = vsel %vm988_vm1, %v4373_v4, 0.0 }
 0x824   :  { %5328 = vmatmul.mubr.msk.bf16.vlgmr.msra.gmra.mrb[36].mxu1 %vm988_vm1, %v4188_v31 }
 0x825   :  { %4377 = vadd.xlane.f32.xlu1 %v4376_v5  ;;  %5333 = vmatprep.mubr.msk.bf16.mxu1 %vm988_vm1, %v4185_v37  ;;  %v4419_v37 = vpop.xlane.xlu0 %4418 }
 0x826   :  { %5332 = vmatpush3.bf16.msra.mxu1 %v5579_v57  ;;  %v4416_v57 = vpop.xlane.xlu1 %4415 }
 0x827   :  { %4380 = vadd.xlane.f32.xlu0 %v4379_v6 }
 0x829   :  { %4449 = vadd.xlane.f32.xlu1 %v4448_v33  ;;  %v4433_v22 = vpop.xlane.xlu0 %4432 }
 0x82a   :  { %v4430_v12 = vpop.xlane.xlu1 %4429 }
 0x82b   :  { %4452 = vadd.xlane.f32.xlu0 %v4451_v2 }
 0x82d   :  { %4455 = vadd.xlane.f32.xlu1 %v4454_v20  ;;  %v4439_v63 = vpop.xlane.xlu0 %4438 }
 0x82e   :  { %v4436_v24 = vpop.xlane.xlu1 %4435 }
 0x82f   :  { %4458 = vadd.xlane.f32.xlu0 %v4457_v13 }
 0x830   :  { %5334 = vmatmul.mubr.msk.bf16.vlgmr.msra.gmra.mrb[36].mxu1 %vm988_vm1, %v4186_v14 }
 0x831   :  { %v4361_v21 = vpop.xlane.xlu0 %4360 }
 0x832   :  { %v4358_v41 = vpop.xlane.xlu1 %4357 }
 0x835   :  { %v4355_v44 = vpop.xlane.xlu0 %4354 }
 0x839   :  { %v4364_v42 = vpop.xlane.xlu0 %4363 }
 0x8ae   :  { %v4384_v49 = vpop.xlane.xlu1 %4383 }
 0x8af   :  { %v4390_v52 = vadd.f32 %v4384_v49, %v4361_v21 }
 0x8b0   :  { %v4387_v27 = vpop.xlane.xlu0 %4386 }
 0x8b1   :  { %v4391_v0 = vadd.f32 %v4387_v27, %v4364_v42  ;;  %v4396_v47 = vadd.f32 %v4393_v19, %v4390_v52 }
 0x8b2   :  { %v4378_v51 = vpop.xlane.xlu1 %4377 }
 0x8b3   :  { %v4388_v50 = vadd.f32 %v4378_v51, %v4355_v44  ;;  %v4397_v48 = vadd.f32 %v4393_v19, %v4391_v0  ;;  %v4422_v54 = vadd.f32 %v4416_v57, %v4396_v47  ;;  %v4442_v31 = vadd.f32 %v4436_v24, %v4396_v47 }
 0x8b4   :  { %v4381_v23 = vpop.xlane.xlu0 %4380 }
 0x8b5   :  { %v4389_v34 = vadd.f32 %v4381_v23, %v4358_v41  ;;  %v4394_v14 = vadd.f32 %v4393_v19, %v4388_v50  ;;  %v4423_v5 = vadd.f32 %v4419_v37, %v4397_v48  ;;  %v4443_v26 = vadd.f32 %v4439_v63, %v4397_v48 }
 0x8b6   :  { %v4450_v62 = vpop.xlane.xlu1 %4449  ;;  %v4466_v55 = vmax.f32 %v4422_v54, %v4442_v31 }
 0x8b7   :  { %v4395_v53 = vadd.f32 %v4393_v19, %v4389_v34  ;;  %v4420_v45 = vadd.f32 %v4410_v36, %v4394_v14  ;;  %v4440_v7 = vadd.f32 %v4430_v12, %v4394_v14  ;;  %v4460_v11 = vadd.f32 %v4450_v62, %v4394_v14 }
 0x8b8   :  { %v4453_v1 = vpop.xlane.xlu0 %4452  ;;  %v4467_v13 = vmax.f32 %v4423_v5, %v4443_v26 }
 0x8b9   :  { %v4421_v38 = vadd.f32 %v4413_v30, %v4395_v53  ;;  %v4441_v46 = vadd.f32 %v4433_v22, %v4395_v53  ;;  %v4464_v3 = vmax.f32 %v4420_v45, %v4440_v7  ;;  %v4461_v33 = vadd.f32 %v4453_v1, %v4395_v53 }
 0x8ba   :  { %v4456_v9 = vpop.xlane.xlu1 %4455 }
 0x8bb   :  { %v4465_v58 = vmax.f32 %v4421_v38, %v4441_v46  ;;  %v4462_v56 = vadd.f32 %v4456_v9, %v4396_v47  ;;  %v4468_v6 = vmax.f32 %v4464_v3, %v4460_v11 }
 0x8bc   :  { %v4459_v4 = vpop.xlane.xlu0 %4458 }
 0x8bd   :  { %v4463_v2 = vadd.f32 %v4459_v4, %v4397_v48  ;;  %v4469_v8 = vmax.f32 %v4465_v58, %v4461_v33  ;;  %v4470_v20 = vmax.f32 %v4466_v55, %v4462_v56  ;;  %v4472_v30 = vsub.f32 %v4420_v45, %v4468_v6  ;;  %v4661_v45 = vld [vmem:[%s6870_s3 + $0x2] ss:$0 sm:$0xff] }
 0x8be   :  { %v4484_v36 = vsub.f32 %v4440_v7, %v4468_v6  ;;  %v4496_v51 = vsub.f32 %v4460_v11, %v4468_v6  ;;  %v946_v3 = vadd.f32 %v4661_v45, %v6490_v25  ;;  %v947_v11 = vadd.f32 %v4661_v45, %v6494_v61 }
 0x8bf   :  { %v4471_v22 = vmax.f32 %v4467_v13, %v4463_v2  ;;  %v4473_v12 = vsub.f32 %v4421_v38, %v4469_v8  ;;  %v4474_v21 = vsub.f32 %v4422_v54, %v4470_v20  ;;  %v4476_v57 = vmul.f32 1.442695, %v4472_v30 }
 0x8c0   :  { %v4486_v24 = vsub.f32 %v4442_v31, %v4470_v20  ;;  %v4488_v44 = vmul.f32 1.442695, %v4484_v36  ;;  %v4485_v37 = vsub.f32 %v4441_v46, %v4469_v8  ;;  %v4498_v50 = vsub.f32 %v4462_v56, %v4470_v20 }
 0x8c1   :  { %v4475_v41 = vsub.f32 %v4423_v5, %v4471_v22  ;;  %v4478_v42 = vmul.f32 1.442695, %v4473_v12  ;;  %v4487_v49 = vsub.f32 %v4443_v26, %v4471_v22  ;;  %v4480_v63 = vmul.f32 1.442695, %v4474_v21 }
 0x8c2   :  { %5612 = vpow2.f32 %v4476_v57  ;;  %v4492_v27 = vmul.f32 1.442695, %v4486_v24  ;;  %v4490_v19 = vmul.f32 1.442695, %v4485_v37  ;;  %v4499_v14 = vsub.f32 %v4463_v2, %v4471_v22 }
 0x8c3   :  { %5614 = vpow2.f32 %v4488_v44  ;;  %v4482_v23 = vmul.f32 1.442695, %v4475_v41  ;;  %v4494_v34 = vmul.f32 1.442695, %v4487_v49  ;;  %v4500_v52 = vmul.f32 1.442695, %v4496_v51 }
 0x8c4   :  { %5616 = vpow2.f32 %v4478_v42  ;;  %v4497_v53 = vsub.f32 %v4461_v33, %v4469_v8  ;;  %v4504_v62 = vmul.f32 1.442695, %v4498_v50  ;;  %v4506_v0 = vmul.f32 1.442695, %v4499_v14 }
 0x8c5   :  { %5618 = vpow2.f32 %v4480_v63  ;;  %v948_v46 = vadd.f32 %v6488_v16, %v4661_v45  ;;  %v949_v54 = vadd.f32 %v6492_v60, %v4661_v45  ;;  %v4662_v26 = vmul.f32 -1.442695, %v946_v3 }
 0x8c6   :  { %5620 = vpow2.f32 %v4492_v27  ;;  %v4502_v7 = vmul.f32 1.442695, %v4497_v53  ;;  %v4663_v16 = vmul.f32 -1.442695, %v947_v11 }
 0x8c7   :  { %5622 = vpow2.f32 %v4482_v23  ;;  %v4664_v4 = vmul.f32 -1.442695, %v948_v46  ;;  %v4665_v33 = vmul.f32 -1.442695, %v949_v54 }
 0x8c8   :  { %5624 = vpow2.f32 %v4494_v34  ;;  %v4311_v34 = vld [vmem:[#allocation16] sm:$0xff] }
 0x8c9   :  { %5626 = vpow2.f32 %v4490_v19 }
 0x8ca   :  { %5628 = vpow2.f32 %v4500_v52 }
 0x8cb   :  { %5630 = vpow2.f32 %v4504_v62  ;;  %v4312_v62 = vld [vmem:[#allocation16 + $0x8] sm:$0xff] }
 0x8cc   :  { %v5613_v1 = vpop.eup %5612  ;;  %5632 = vpow2.f32 %v4506_v0 }
 0x8cd   :  { %v5615_v47 = vpop.eup %5614  ;;  %5634 = vpow2.f32 %v4502_v7 }
 0x8ce   :  { %v5617_v38 = vpop.eup %5616  ;;  %v4508_v56 = vadd.f32 %v5615_v47, %v5613_v1  ;;  %5636 = vpow2.f32 %v4664_v4 }
 0x8cf   :  { %v5619_v48 = vpop.eup %5618  ;;  %5638 = vpow2.f32 %v4662_v26 }
 0x8d0   :  { %v5621_v9 = vpop.eup %5620  ;;  %5640 = vpow2.f32 %v4665_v33 }
 0x8d1   :  { %v5623_v31 = vpop.eup %5622  ;;  %v4510_v6 = vadd.f32 %v5621_v9, %v5619_v48  ;;  %5642 = vpow2.f32 %v4663_v16 }
 0x8d2   :  { %v5625_v58 = vpop.eup %5624 }
 0x8d3   :  { %v5627_v5 = vpop.eup %5626  ;;  %v4511_v2 = vadd.f32 %v5625_v58, %v5623_v31 }
 0x8d4   :  { %v5629_v55 = vpop.eup %5628  ;;  %v4509_v20 = vadd.f32 %v5627_v5, %v5617_v38 }
 0x8d5   :  { %v5631_v8 = vpop.eup %5630  ;;  %v4512_v25 = vadd.f32 %v5629_v55, %v4508_v56 }
 0x8d6   :  { %v4514_v13 = vadd.f32 %v5631_v8, %v4510_v6  ;;  %v5633_v60 = vpop.eup %5632 }
 0x8d7   :  { %v5635_v30 = vpop.eup %5634  ;;  %v4515_v61 = vadd.f32 %v5633_v60, %v4511_v2  ;;  %5644 = vrcp.f32 %v4512_v25 }
 0x8d8   :  { %v4513_v36 = vadd.f32 %v5635_v30, %v4509_v20  ;;  %5646 = vrcp.f32 %v4514_v13  ;;  %v5637_v22 = vpop.eup %5636 }
 0x8d9   :  { %5648 = vrcp.f32 %v4515_v61  ;;  %v5639_v12 = vpop.eup %5638  ;;  %v964_v44 = vadd.f32 1.0, %v5637_v22 }
 0x8da   :  { %5650 = vrcp.f32 %v4513_v36  ;;  %v5641_v21 = vpop.eup %5640  ;;  %v962_v42 = vadd.f32 1.0, %v5639_v12 }
 0x8db   :  { %v5643_v57 = vpop.eup %5642  ;;  %v965_v49 = vadd.f32 1.0, %v5641_v21  ;;  %5652 = vrcp.f32 %v964_v44 }
 0x8dc   :  { %v963_v63 = vadd.f32 1.0, %v5643_v57  ;;  %5654 = vrcp.f32 %v962_v42 }
 0x8dd   :  { %5656 = vrcp.f32 %v965_v49 }
 0x8de   :  { %5658 = vrcp.f32 %v963_v63 }
 0x8e1   :  { %v5645_v24 = vpop.eup %5644 }
 0x8e2   :  { %v5647_v41 = vpop.eup %5646  ;;  %v4524_v51 = vmul.f32 %v5645_v24, %v5613_v1  ;;  %v4532_v19 = vmul.f32 %v5645_v24, %v5615_v47 }
 0x8e3   :  { %v5649_v37 = vpop.eup %5648  ;;  %v4526_v23 = vmul.f32 %v5647_v41, %v5619_v48  ;;  %v4534_v50 = vmul.f32 %v5647_v41, %v5621_v9  ;;  %v4546_v11 = vmul.f32 %v5647_v41, %v5631_v8 }
 0x8e4   :  { %v5651_v27 = vpop.eup %5650  ;;  %v4527_v14 = vmul.f32 %v5649_v37, %v5623_v31  ;;  %v4535_v52 = vmul.f32 %v5649_v37, %v5625_v58  ;;  %v4528_v3 = vmul.f32 %v4524_v51, %v6591_v28  ;;  %v4536_v47 = vmul.f32 %v4532_v19, %v6681_v18 }
 0x8e5   :  { %v4525_v0 = vmul.f32 %v5651_v27, %v5617_v38  ;;  %v4533_v45 = vmul.f32 %v5651_v27, %v5627_v5  ;;  %v4530_v54 = vmul.f32 %v4526_v23, %v6610_v15  ;;  %v4538_v1 = vmul.f32 %v4534_v50, %v6693_v39  ;;  %v5653_v33 = vpop.eup %5652 }
 0x8e6   :  { %v4531_v4 = vmul.f32 %v4527_v14, %v6598_v29  ;;  %v4539_v38 = vmul.f32 %v4535_v52, %v6685_v35  ;;  %v4544_v5 = vmul.f32 %v5645_v24, %v5629_v55  ;;  %v4547_v39 = vmul.f32 %v5649_v37, %v5633_v60  ;;  %v5655_v29 = vpop.eup %5654 }
 0x8e7   :  { %v4529_v28 = vmul.f32 %v4525_v0, %v6578_v17  ;;  %v4537_v15 = vmul.f32 %v4533_v45, %v6676_v32  ;;  %v4542_v26 = vadd.f32 %v4538_v1, %v4530_v54  ;;  %v4545_v18 = vmul.f32 %v5651_v27, %v5635_v30  ;;  %v5657_v25 = vpop.eup %5656 }
 0x8e8   :  { %v4540_v6 = vadd.f32 %v4536_v47, %v4528_v3  ;;  %v4550_v16 = vmul.f32 %v4546_v11, %v6786_v10  ;;  %v4543_v2 = vadd.f32 %v4539_v38, %v4531_v4  ;;  %v4548_v35 = vmul.f32 %v4544_v5, %v6776_v43  ;;  %v5659_v20 = vpop.eup %5658 }
 0x8e9   :  { %v4541_v8 = vadd.f32 %v4537_v15, %v4529_v28  ;;  %v4551_v55 = vmul.f32 %v4547_v39, %v6794_v59  ;;  %v4549_v32 = vmul.f32 %v4545_v18, %v6779_v40  ;;  %v4558_v60 = vsub.f32 1.0, %v5653_v33 }
 0x8ea   :  { %v4554_v17 = vadd.f32 %v4550_v16, %v4542_v26  ;;  %v4552_v13 = vadd.f32 %v4548_v35, %v4540_v6  ;;  %v4556_v36 = vsub.f32 1.0, %v5655_v29  ;;  %v4559_v57 = vsub.f32 1.0, %v5657_v25 }
 0x8eb   :  { %v4555_v61 = vadd.f32 %v4551_v55, %v4543_v2  ;;  %v4553_v22 = vadd.f32 %v4549_v32, %v4541_v8  ;;  %v4557_v41 = vsub.f32 1.0, %v5659_v20 }
 0x8ec   :  { %v4566_v21 = vmul.f32 %v5653_v33, %v4554_v17  ;;  %v4564_v44 = vmul.f32 %v5655_v29, %v4552_v13 }
 0x8ed   :  { %v4567_v37 = vmul.f32 %v5657_v25, %v4555_v61  ;;  %v4565_v27 = vmul.f32 %v5659_v20, %v4553_v22 }
 0x903   :  { %v5335_v53 = vpop.f32.mrb[36].mxu1 }
 0x904   :  { %v4315_v7 = vadd.f32 %v5335_v53, %v4311_v34  ;;  %v4296_v46 = vpop.f32.mrb[37].mxu1 }
 0x905   :  { %v4313_v48 = vadd.f32 %v4311_v34, %v4296_v46  ;;  %v5336_v9 = vpop.f32.mrb[38].mxu1 }
 0x906   :  { %5660 = vtanh.f32 %v4315_v7  ;;  %v4316_v31 = vadd.f32 %v5336_v9, %v4312_v62  ;;  %v4299_v58 = vpop.f32.mrb[39].mxu1 }
 0x907   :  { %5662 = vtanh.f32 %v4313_v48  ;;  %v4314_v56 = vadd.f32 %v4312_v62, %v4299_v58 }
 0x908   :  { %5664 = vtanh.f32 %v4316_v31 }
 0x909   :  { %5666 = vtanh.f32 %v4314_v56 }
 0x910   :  { %v5661_v30 = vpop.eup %5660 }
 0x911   :  { %v5663_v12 = vpop.eup %5662  ;;  %v4562_v10 = vmul.f32 %v5661_v30, %v4558_v60 }
 0x912   :  { %v5665_v24 = vpop.eup %5664  ;;  %v4560_v43 = vmul.f32 %v5663_v12, %v4556_v36 }
 0x913   :  { %v5667_v42 = vpop.eup %5666  ;;  %v4570_v59 = vadd.f32 %v4566_v21, %v4562_v10  ;;  %v4563_v49 = vmul.f32 %v5665_v24, %v4559_v57 }
 0x914   :  { %v4568_v63 = vadd.f32 %v4564_v44, %v4560_v43  ;;  %v4561_v40 = vmul.f32 %v5667_v42, %v4557_v41 }
 0x915   :  { %4574 = vst.msk [vmem:[%s6897_s17 + $0x10] sm:$0xff] %vm264_vm0, %v4570_v59  ;;  %4783 = vst.msk [vmem:[%s6885_s18 + $0x50] sm:$0xff] %vm264_vm0, %v4570_v59  ;;  %v4571_v51 = vadd.f32 %v4567_v37, %v4563_v49 }
 0x916   :  { %4572 = vst.msk [vmem:[%s6897_s17] sm:$0xff] %vm264_vm0, %v4568_v63  ;;  %4781 = vst.msk [vmem:[%s6885_s18 + $0x40] sm:$0xff] %vm264_vm0, %v4568_v63  ;;  %v4569_v23 = vadd.f32 %v4565_v27, %v4561_v40 }
 0x917   :  { %4575 = vst.msk [vmem:[%s6897_s17 + $0x18] sm:$0xff] %vm264_vm0, %v4571_v51  ;;  %4784 = vst.msk [vmem:[%s6885_s18 + $0x58] sm:$0xff] %vm264_vm0, %v4571_v51 }
 0x918   :  { %4573 = vst.msk [vmem:[%s6897_s17 + $0x8] sm:$0xff] %vm264_vm0, %v4569_v23  ;;  %4782 = vst.msk [vmem:[%s6885_s18 + $0x48] sm:$0xff] %vm264_vm0, %v4569_v23 }
 0x919   :  { %4598 = vsyncpa [#allocation4], 1 }
 0x91a   :  { %4599 = vsyncpa [#allocation6], 1 }
 0x91b   :  { %4600 = vsyncpa [#allocation9], 1 }
 0x91c   :  { %4601 = vsyncpa [#allocation12], 1 }
 0x91d   :  { %4602 = vsyncpa [#allocation15], 1 }
 0x91e   :  { %4603 = vsyncpa [#allocation18], 1 }
 0x91f   :  { %4604 = vsyncpa [#allocation21], 1 }

</bundles_post_ra>
